<compile_context>
chip_gen: v7x
topology: tpu7x:2x2x1
jax: 0.10.0
libtpu: 0.0.40
codegen_flags: <defaults>
</compile_context>

<pallas_src>
import functools
import math

import jax
import jax.numpy as jnp
from jax.experimental import pallas as pl
from jax.experimental.pallas import tpu as pltpu


# ----------------------------- fused encoder kernel ------------------------------

def _layer_norm(x, g, b, eps=1e-5):
    mu = jnp.mean(x, axis=-1, keepdims=True)
    var = jnp.mean((x - mu) ** 2, axis=-1, keepdims=True)
    return (x - mu) * jax.lax.rsqrt(var + eps) * g + b


def _encoder_kernel(xt_ref, xv_ref, wt_ref, bt_ref, wv_ref, bv_ref,
                    wqkv_ref, bqkv_ref, wo_ref, bo_ref,
                    ln1g_ref, ln1b_ref, w1_ref, b1_ref, w2_ref, b2_ref,
                    ln2g_ref, ln2b_ref, wlogT_ref, blog_ref,
                    logits_ref, x_scr,
                    *, N, L, txt_L, vis_L, d_model, n_heads, nl_pad):
    layer = pl.program_id(0)
    d_head = d_model // n_heads
    scale = 1.0 / math.sqrt(d_head)
    NL = N * L

    # ----- step 0: fused input projection.
    # Host pre-fused weights: (wt@we)*sqrt(d_model), (wv@we)*sqrt(d_model); the bias
    # rows already carry (b*we + be)*sqrt(d_model) + modality embedding.
    @pl.when(layer == 0)
    def _init():
        t = jnp.dot(xt_ref[...], wt_ref[...],
                    preferred_element_type=jnp.float32) + bt_ref[...]   # (N*txt_L, Dm)
        v = jnp.dot(xv_ref[...], wv_ref[...],
                    preferred_element_type=jnp.float32) + bv_ref[...]   # (N*vis_L, Dm)
        # batch-major token layout: per batch b, rows [b*L, b*L+txt_L) = text,
        # rows [b*L+txt_L, (b+1)*L) = visual frames (same concat order as PyTorch).
        pieces = []
        for b in range(N):
            pieces.append(t[b * txt_L:(b + 1) * txt_L, :])
            pieces.append(v[b * vis_L:(b + 1) * vis_L, :])
        x_scr[...] = jnp.concatenate(pieces, axis=0)                    # (NL, Dm) f32

    # ----- one transformer encoder layer (post-norm, relu FFN), all in VMEM -----
    x = x_scr[...]                                                      # (NL, Dm) f32
    qkv = jnp.dot(x.astype(jnp.bfloat16), wqkv_ref[0],
                  preferred_element_type=jnp.float32) + bqkv_ref[0]     # (NL, 3*Dm) f32

    # Per-batch attention: (L, L) scores only — no (NL, NL) mask.  N and n_heads are
    # small compile-time constants, so the Python unroll stays cheap here.
    batch_outs = []
    for b in range(N):
        r0 = b * L
        head_outs = []
        for h in range(n_heads):
            qh = qkv[r0:r0 + L, h * d_head:(h + 1) * d_head].astype(jnp.bfloat16)
            kh = qkv[r0:r0 + L,
                     d_model + h * d_head:d_model + (h + 1) * d_head].astype(jnp.bfloat16)
            vh = qkv[r0:r0 + L,
                     2 * d_model + h * d_head:2 * d_model + (h + 1) * d_head].astype(jnp.bfloat16)
            s = jax.lax.dot_general(qh, kh, (((1,), (1,)), ((), ())),
                                    preferred_element_type=jnp.float32) * scale
            m = jnp.max(s, axis=-1, keepdims=True)                      # f32 softmax
            p = jnp.exp(s - m)
            p = p * pl.reciprocal(jnp.sum(p, axis=-1, keepdims=True), approx=True)
            head_outs.append(jnp.dot(p.astype(jnp.bfloat16), vh,
                                     preferred_element_type=jnp.float32))   # (L, Dh)
        batch_outs.append(jnp.concatenate(head_outs, axis=-1))          # (L, Dm)
    concat = jnp.concatenate(batch_outs, axis=0)                        # (NL, Dm) f32

    # single full-K out-projection of the concatenated heads
    attn = jnp.dot(concat.astype(jnp.bfloat16), wo_ref[0],
                   preferred_element_type=jnp.float32) + bo_ref[0]

    src = _layer_norm(x + attn, ln1g_ref[0], ln1b_ref[0])               # f32
    ff = jnp.maximum(jnp.dot(src.astype(jnp.bfloat16), w1_ref[0],
                             preferred_element_type=jnp.float32) + b1_ref[0], 0.0)
    ff = jnp.dot(ff.astype(jnp.bfloat16), w2_ref[0],
                 preferred_element_type=jnp.float32) + b2_ref[0]
    out = _layer_norm(src + ff, ln2g_ref[0], ln2b_ref[0])
    x_scr[...] = out

    # ----- last step: lane-dense logits (1, nl_pad), padded to a 128 multiple -----
    @pl.when(layer == pl.num_programs(0) - 1)
    def _final():
        lg = jax.lax.dot_general(wlogT_ref[...], out, (((1,), (1,)), ((), ())),
                                 preferred_element_type=jnp.float32) + blog_ref[...]
        if nl_pad > NL:
            lg = jnp.concatenate(
                [lg, jnp.zeros((1, nl_pad - NL), jnp.float32)], axis=-1)
        logits_ref[...] = lg.astype(logits_ref.dtype)


def _const_spec(a):
    nd = a.ndim
    return pl.BlockSpec(tuple(a.shape), lambda l, _nd=nd: (0,) * _nd)


def _layer_spec(a):
    r = a.ndim - 1
    return pl.BlockSpec((1,) + tuple(a.shape[1:]), lambda l, _r=r: (l,) + (0,) * _r)


# ------------------- frame extraction (data-dependent DMA gather) -----------------

def _extract_kernel(idx_ref, x_ref, o_ref):
    # The gather itself is done by the data-dependent index_map; this is a pure copy.
    o_ref[...] = x_ref[...]


def pallas_extract_frames(x_vis, indices):
    N, L, n_tok, c = x_vis.shape
    k = indices.shape[-1]
    return pl.pallas_call(
        _extract_kernel,
        out_shape=jax.ShapeDtypeStruct((N, k, n_tok, c), x_vis.dtype),
        grid_spec=pltpu.PrefetchScalarGridSpec(
            num_scalar_prefetch=1,
            grid=(N, k),
            in_specs=[pl.BlockSpec((1, 1, n_tok, c),
                                   lambda b, j, idx: (b, idx[b, j], 0, 0))],
            out_specs=pl.BlockSpec((1, 1, n_tok, c),
                                   lambda b, j, idx: (b, j, 0, 0))),
        compiler_params=pltpu.CompilerParams(
            dimension_semantics=("arbitrary", "arbitrary")),
    )(indices, x_vis)


# ------------------------------- parameters --------------------------------------

def init_params(key, *, d_input_t, d_input_v, d_input, d_model, d_ff, n_layers):
    ks = jax.random.split(key, 10)

    def dense(k, fi, fo, scale=0.02):
        kw, kb = jax.random.split(k)
        return {"w": jax.random.normal(kw, (fi, fo), jnp.float32) * scale,
                "b": jax.random.normal(kb, (fo,), jnp.float32) * scale}

    def stacked(k, fi, fo, scale=0.02):
        kw, kb = jax.random.split(k)
        return (jax.random.normal(kw, (n_layers, fi, fo), jnp.float32) * scale,
                jax.random.normal(kb, (n_layers, 1, fo), jnp.float32) * scale)

    wqkv, bqkv = stacked(ks[5], d_model, 3 * d_model)
    wo, bo = stacked(ks[6], d_model, d_model)
    w1, b1 = stacked(ks[7], d_model, d_ff)
    w2, b2 = stacked(ks[8], d_ff, d_model)

    return {
        "t_embedding": dense(ks[0], d_input_t, d_input),
        "v_embedding": dense(ks[1], d_input_v, d_input),
        "embedding": dense(ks[2], d_input, d_model),
        "logits": dense(ks[3], d_model, 1),
        "modality_embedding": jax.random.normal(ks[4], (5, d_model), jnp.float32) * 0.02,
        "layers": {
            "wqkv": wqkv, "bqkv": bqkv, "wo": wo, "bo": bo,
            "w1": w1, "b1": b1, "w2": w2, "b2": b2,
            "ln1_g": jnp.ones((n_layers, 1, d_model), jnp.float32),
            "ln1_b": jnp.zeros((n_layers, 1, d_model), jnp.float32),
            "ln2_g": jnp.ones((n_layers, 1, d_model), jnp.float32),
            "ln2_b": jnp.zeros((n_layers, 1, d_model), jnp.float32),
        },
    }


# ------------------------------ forward pass -------------------------------------

def topk_selector_forward(params, x_vis, x_txt, *, num_select, n_heads):
    N, vis_L, n_tok, d_v = x_vis.shape
    _, txt_L, d_t = x_txt.shape
    d_model = params["embedding"]["w"].shape[1]
    n_layers = params["layers"]["wqkv"].shape[0]
    L = txt_L + vis_L
    NL = N * L
    nl_pad = ((NL + 127) // 128) * 128
    Lp = params["layers"]
    sq = math.sqrt(d_model)

    # host-side fusion of the three input linears + sqrt(d_model) scale + modality emb
    we, be = params["embedding"]["w"], params["embedding"]["b"]
    wt, bt = params["t_embedding"]["w"], params["t_embedding"]["b"]
    wv, bv = params["v_embedding"]["w"], params["v_embedding"]["b"]
    mod = params["modality_embedding"]
    wt_fused = ((wt @ we) * sq).astype(jnp.bfloat16)                 # (d_t, d_model)
    wv_fused = ((wv @ we) * sq).astype(jnp.bfloat16)                 # (d_v, d_model)
    bt_row = ((bt @ we + be) * sq + mod[0]).reshape(1, d_model)      # TEXT_QUESTION
    bv_row = ((bv @ we + be) * sq + mod[3]).reshape(1, d_model)      # VISUAL_EMBEDDING

    # raw inputs, batch-major flattening (CLS token of each frame, like PyTorch)
    xt = x_txt.reshape(N * txt_L, d_t).astype(jnp.bfloat16)
    xv = x_vis[:, :, 0, :].reshape(N * vis_L, d_v).astype(jnp.bfloat16)

    wlogT = params["logits"]["w"].reshape(1, d_model)                # lane-dense head
    blog = params["logits"]["b"].reshape(1, 1)

    in_arrays = [
        xt, xv, wt_fused, bt_row, wv_fused, bv_row,
        Lp["wqkv"].astype(jnp.bfloat16), Lp["bqkv"],
        Lp["wo"].astype(jnp.bfloat16), Lp["bo"],
        Lp["ln1_g"], Lp["ln1_b"],
        Lp["w1"].astype(jnp.bfloat16), Lp["b1"],
        Lp["w2"].astype(jnp.bfloat16), Lp["b2"],
        Lp["ln2_g"], Lp["ln2_b"],
        wlogT, blog,
    ]
    in_specs = ([_const_spec(a) for a in in_arrays[:6]]
                + [_layer_spec(a) for a in in_arrays[6:18]]
                + [_const_spec(a) for a in in_arrays[18:]])

    # explicit VMEM budget: consts + double-buffered per-layer blocks + activations
    const_bytes = sum(int(a.size) * a.dtype.itemsize
                      for a in in_arrays[:6] + in_arrays[18:])
    layer_bytes = sum(2 * (int(a.size) // n_layers) * a.dtype.itemsize
                      for a in in_arrays[6:18])
    work_bytes = NL * d_model * 4 * 10 + nl_pad * 4
    vmem_limit = int(min(max(2 * (const_bytes + layer_bytes + work_bytes) + (8 << 20),
                             32 << 20), 64 << 20))

    kernel = functools.partial(_encoder_kernel, N=N, L=L, txt_L=txt_L, vis_L=vis_L,
                               d_model=d_model, n_heads=n_heads, nl_pad=nl_pad)

    logits_flat = pl.pallas_call(
        kernel,
        out_shape=jax.ShapeDtypeStruct((1, nl_pad), jnp.float32),
        grid_spec=pltpu.PrefetchScalarGridSpec(
            num_scalar_prefetch=0,
            grid=(n_layers,),
            in_specs=in_specs,
            out_specs=pl.BlockSpec((1, nl_pad), lambda l: (0, 0)),
            scratch_shapes=[pltpu.VMEM((NL, d_model), jnp.float32)]),
        compiler_params=pltpu.CompilerParams(
            dimension_semantics=("arbitrary",),
            vmem_limit_bytes=vmem_limit),
    )(*in_arrays)

    # visual-frame logits, per batch, in frame order
    logits = logits_flat[0, :NL].reshape(N, L)[:, txt_L:]             # (N, vis_L)

    # HardTopK (inference path of the module).
    # TODO(synk): top-k / sort has no clean Pallas TPU primitive; done with jax.lax.top_k.
    _, idx = jax.lax.top_k(logits, num_select)
    idx = jnp.sort(idx, axis=-1).astype(jnp.int32)

    # extract_frames_from_indices: scalar-prefetch data-dependent gather (DMA only)
    return pallas_extract_frames(x_vis, idx)


# ---------------------------------- main ------------------------------------------

if __name__ == "__main__":
    # small, consistent config
    d_input_t, d_input_v, d_input = 64, 48, 32
    d_model, d_ff, n_heads, n_layers = 32, 32, 4, 2
    num_select = 4
    N, vis_L, n_tok, txt_L = 2, 8, 4, 3

    key = jax.random.PRNGKey(0)
    kp, kv, kt = jax.random.split(key, 3)
    params = init_params(kp, d_input_t=d_input_t, d_input_v=d_input_v,
                         d_input=d_input, d_model=d_model, d_ff=d_ff,
                         n_layers=n_layers)

    x_vis = jax.random.normal(kv, (N, vis_L, n_tok, d_input_v), jnp.float32)
    x_txt = jax.random.normal(kt, (N, txt_L, d_input_t), jnp.float32)

    fwd = jax.jit(functools.partial(topk_selector_forward,
                                    num_select=num_select, n_heads=n_heads))
    qa_frames = fwd(params, x_vis, x_txt)
    qa_frames = jax.block_until_ready(qa_frames)
    assert qa_frames.shape == (N, num_select, n_tok, d_input_v)
    print("KERNEL_OK")
</pallas_src>

<mosaic_0001>
module attributes {stable_mosaic.version = 11 : i64} {
  func.func @_encoder_kernel(%arg0: i32, %arg1: memref<6x64xbf16, #tpu.memory_space<vmem>>, %arg2: memref<16x48xbf16, #tpu.memory_space<vmem>>, %arg3: memref<64x32xbf16, #tpu.memory_space<vmem>>, %arg4: memref<1x32xf32, #tpu.memory_space<vmem>>, %arg5: memref<48x32xbf16, #tpu.memory_space<vmem>>, %arg6: memref<1x32xf32, #tpu.memory_space<vmem>>, %arg7: memref<1x32x96xbf16, #tpu.memory_space<vmem>>, %arg8: memref<1x1x96xf32, #tpu.memory_space<vmem>>, %arg9: memref<1x32x32xbf16, #tpu.memory_space<vmem>>, %arg10: memref<1x1x32xf32, #tpu.memory_space<vmem>>, %arg11: memref<1x1x32xf32, #tpu.memory_space<vmem>>, %arg12: memref<1x1x32xf32, #tpu.memory_space<vmem>>, %arg13: memref<1x32x32xbf16, #tpu.memory_space<vmem>>, %arg14: memref<1x1x32xf32, #tpu.memory_space<vmem>>, %arg15: memref<1x32x32xbf16, #tpu.memory_space<vmem>>, %arg16: memref<1x1x32xf32, #tpu.memory_space<vmem>>, %arg17: memref<1x1x32xf32, #tpu.memory_space<vmem>>, %arg18: memref<1x1x32xf32, #tpu.memory_space<vmem>>, %arg19: memref<1x32xf32, #tpu.memory_space<vmem>>, %arg20: memref<1x1xf32, #tpu.memory_space<vmem>>, %arg21: memref<1x128xf32, #tpu.memory_space<vmem>>, %arg22: memref<22x32xf32, #tpu.memory_space<vmem>>) attributes {dimension_semantics = [#tpu.dimension_semantics<arbitrary>], iteration_bounds = array<i64: 2>, scalar_prefetch = 0 : i64, scratch_operands = 1 : i64, tpu.core_type = #tpu.core_type<tc>, window_params = [{pipeline_mode = #tpu.pipeline_mode<synchronous>, transform_indices = @transform_0, window_bounds = array<i64: 6, 64>}, {pipeline_mode = #tpu.pipeline_mode<synchronous>, transform_indices = @transform_1, window_bounds = array<i64: 16, 48>}, {pipeline_mode = #tpu.pipeline_mode<synchronous>, transform_indices = @transform_2, window_bounds = array<i64: 64, 32>}, {pipeline_mode = #tpu.pipeline_mode<synchronous>, transform_indices = @transform_3, window_bounds = array<i64: 1, 32>}, {pipeline_mode = #tpu.pipeline_mode<synchronous>, transform_indices = @transform_4, window_bounds = array<i64: 48, 32>}, {pipeline_mode = #tpu.pipeline_mode<synchronous>, transform_indices = @transform_5, window_bounds = array<i64: 1, 32>}, {transform_indices = @transform_6, window_bounds = array<i64: 1, 32, 96>}, {transform_indices = @transform_7, window_bounds = array<i64: 1, 1, 96>}, {transform_indices = @transform_8, window_bounds = array<i64: 1, 32, 32>}, {transform_indices = @transform_9, window_bounds = array<i64: 1, 1, 32>}, {transform_indices = @transform_10, window_bounds = array<i64: 1, 1, 32>}, {transform_indices = @transform_11, window_bounds = array<i64: 1, 1, 32>}, {transform_indices = @transform_12, window_bounds = array<i64: 1, 32, 32>}, {transform_indices = @transform_13, window_bounds = array<i64: 1, 1, 32>}, {transform_indices = @transform_14, window_bounds = array<i64: 1, 32, 32>}, {transform_indices = @transform_15, window_bounds = array<i64: 1, 1, 32>}, {transform_indices = @transform_16, window_bounds = array<i64: 1, 1, 32>}, {transform_indices = @transform_17, window_bounds = array<i64: 1, 1, 32>}, {pipeline_mode = #tpu.pipeline_mode<synchronous>, transform_indices = @transform_18, window_bounds = array<i64: 1, 32>}, {pipeline_mode = #tpu.pipeline_mode<synchronous>, transform_indices = @transform_19, window_bounds = array<i64: 1, 1>}, {pipeline_mode = #tpu.pipeline_mode<synchronous>, transform_indices = @transform_20, window_bounds = array<i64: 1, 128>}]} {
    %c0_i32 = arith.constant 0 : i32
    %0 = arith.cmpi eq, %arg0, %c0_i32 : i32
    %1 = arith.extui %0 : i1 to i32
    %c0_i32_0 = arith.constant 0 : i32
    %2 = arith.cmpi ne, %1, %c0_i32_0 : i32
    scf.if %2 {
      %c0_95 = arith.constant 0 : index
      %c0_96 = arith.constant 0 : index
      %267 = vector.load %arg1[%c0_95, %c0_96] : memref<6x64xbf16, #tpu.memory_space<vmem>>, vector<6x64xbf16>
      %c0_97 = arith.constant 0 : index
      %c0_98 = arith.constant 0 : index
      %268 = vector.load %arg3[%c0_97, %c0_98] : memref<64x32xbf16, #tpu.memory_space<vmem>>, vector<64x32xbf16>
      %cst_99 = arith.constant dense<0.000000e+00> : vector<6x32xf32>
      %269 = tpu.matmul %267, %268, %cst_99 {dimension_numbers = #tpu.dot_dimension_numbers<[1], [0], [0], [1], [0, 0, 1, 1], [], []>} : vector<6x64xbf16>, vector<64x32xbf16>, vector<6x32xf32> -> vector<6x32xf32>
      %c0_100 = arith.constant 0 : index
      %c0_101 = arith.constant 0 : index
      %270 = vector.load %arg4[%c0_100, %c0_101] : memref<1x32xf32, #tpu.memory_space<vmem>>, vector<1x32xf32>
      %271 = vector.broadcast %270 : vector<1x32xf32> to vector<6x32xf32>
      %272 = arith.addf %269, %271 : vector<6x32xf32>
      %c0_102 = arith.constant 0 : index
      %c0_103 = arith.constant 0 : index
      %273 = vector.load %arg2[%c0_102, %c0_103] : memref<16x48xbf16, #tpu.memory_space<vmem>>, vector<16x48xbf16>
      %c0_104 = arith.constant 0 : index
      %c0_105 = arith.constant 0 : index
      %274 = vector.load %arg5[%c0_104, %c0_105] : memref<48x32xbf16, #tpu.memory_space<vmem>>, vector<48x32xbf16>
      %cst_106 = arith.constant dense<0.000000e+00> : vector<16x32xf32>
      %275 = tpu.matmul %273, %274, %cst_106 {dimension_numbers = #tpu.dot_dimension_numbers<[1], [0], [0], [1], [0, 0, 1, 1], [], []>} : vector<16x48xbf16>, vector<48x32xbf16>, vector<16x32xf32> -> vector<16x32xf32>
      %c0_107 = arith.constant 0 : index
      %c0_108 = arith.constant 0 : index
      %276 = vector.load %arg6[%c0_107, %c0_108] : memref<1x32xf32, #tpu.memory_space<vmem>>, vector<1x32xf32>
      %277 = vector.broadcast %276 : vector<1x32xf32> to vector<16x32xf32>
      %278 = arith.addf %275, %277 : vector<16x32xf32>
      %279 = vector.extract_strided_slice %272 {offsets = [0, 0], sizes = [3, 32], strides = [1, 1]} : vector<6x32xf32> to vector<3x32xf32>
      %280 = vector.extract_strided_slice %278 {offsets = [0, 0], sizes = [8, 32], strides = [1, 1]} : vector<16x32xf32> to vector<8x32xf32>
      %281 = vector.extract_strided_slice %272 {offsets = [3, 0], sizes = [3, 32], strides = [1, 1]} : vector<6x32xf32> to vector<3x32xf32>
      %282 = vector.extract_strided_slice %278 {offsets = [8, 0], sizes = [8, 32], strides = [1, 1]} : vector<16x32xf32> to vector<8x32xf32>
      %283 = tpu.concatenate %279, %280, %281, %282 in 0 : vector<3x32xf32>, vector<8x32xf32>, vector<3x32xf32>, vector<8x32xf32> -> vector<22x32xf32>
      %c0_109 = arith.constant 0 : index
      %c0_110 = arith.constant 0 : index
      %284 = vector.load %arg22[%c0_109, %c0_110] : memref<22x32xf32, #tpu.memory_space<vmem>>, vector<22x32xf32>
      tpu.vector_store %arg22[%c0_109, %c0_110], %283 {strides = array<i32>} : memref<22x32xf32, #tpu.memory_space<vmem>>, vector<22x32xf32>,
    } else {
    }
    %c0 = arith.constant 0 : index
    %c0_1 = arith.constant 0 : index
    %3 = vector.load %arg22[%c0, %c0_1] : memref<22x32xf32, #tpu.memory_space<vmem>>, vector<22x32xf32>
    %4 = arith.truncf %3 : vector<22x32xf32> to vector<22x32xbf16>
    %c0_2 = arith.constant 0 : index
    %c0_3 = arith.constant 0 : index
    %c0_4 = arith.constant 0 : index
    %5 = vector.load %arg7[%c0_2, %c0_3, %c0_4] : memref<1x32x96xbf16, #tpu.memory_space<vmem>>, vector<1x32x96xbf16>
    %6 = vector.shape_cast %5 : vector<1x32x96xbf16> to vector<32x96xbf16>
    %cst = arith.constant dense<0.000000e+00> : vector<22x96xf32>
    %7 = tpu.matmul %4, %6, %cst {dimension_numbers = #tpu.dot_dimension_numbers<[1], [0], [0], [1], [0, 0, 1, 1], [], []>} : vector<22x32xbf16>, vector<32x96xbf16>, vector<22x96xf32> -> vector<22x96xf32>
    %c0_5 = arith.constant 0 : index
    %c0_6 = arith.constant 0 : index
    %c0_7 = arith.constant 0 : index
    %8 = vector.load %arg8[%c0_5, %c0_6, %c0_7] : memref<1x1x96xf32, #tpu.memory_space<vmem>>, vector<1x1x96xf32>
    %9 = vector.shape_cast %8 : vector<1x1x96xf32> to vector<1x96xf32>
    %10 = vector.broadcast %9 : vector<1x96xf32> to vector<22x96xf32>
    %11 = arith.addf %7, %10 : vector<22x96xf32>
    %12 = vector.extract_strided_slice %11 {offsets = [0, 0], sizes = [11, 8], strides = [1, 1]} : vector<22x96xf32> to vector<11x8xf32>
    %13 = arith.truncf %12 : vector<11x8xf32> to vector<11x8xbf16>
    %14 = vector.extract_strided_slice %11 {offsets = [0, 32], sizes = [11, 8], strides = [1, 1]} : vector<22x96xf32> to vector<11x8xf32>
    %15 = arith.truncf %14 : vector<11x8xf32> to vector<11x8xbf16>
    %16 = vector.extract_strided_slice %11 {offsets = [0, 64], sizes = [11, 8], strides = [1, 1]} : vector<22x96xf32> to vector<11x8xf32>
    %17 = arith.truncf %16 : vector<11x8xf32> to vector<11x8xbf16>
    %cst_8 = arith.constant dense<0.000000e+00> : vector<11x11xf32>
    %18 = tpu.matmul %13, %15, %cst_8 {dimension_numbers = #tpu.dot_dimension_numbers<[1], [1], [0], [0], [0, 0, 1, 0], [], []>} : vector<11x8xbf16>, vector<11x8xbf16>, vector<11x11xf32> -> vector<11x11xf32>
    %cst_9 = arith.constant 0.353553385 : f32
    %19 = vector.broadcast %cst_9 : f32 to vector<11x11xf32>
    %20 = arith.mulf %18, %19 : vector<11x11xf32>
    %cst_10 = arith.constant dense<0xFF800000> : vector<11xf32>
    %21 = vector.multi_reduction <maximumf>, %20, %cst_10 [1] : vector<11x11xf32> to vector<11xf32>
    %22 = vector.shape_cast %21 : vector<11xf32> to vector<11x1xf32>
    %23 = vector.broadcast %22 : vector<11x1xf32> to vector<11x11xf32>
    %24 = arith.subf %20, %23 : vector<11x11xf32>
    %25 = math.exp %24 : vector<11x11xf32>
    %cst_11 = arith.constant dense<0.000000e+00> : vector<11xf32>
    %26 = vector.multi_reduction <add>, %25, %cst_11 [1] : vector<11x11xf32> to vector<11xf32>
    %27 = vector.shape_cast %26 : vector<11xf32> to vector<11x1xf32>
    %28 = tpu.reciprocal %27 {approx = true} : vector<11x1xf32> -> vector<11x1xf32>
    %29 = vector.broadcast %28 : vector<11x1xf32> to vector<11x11xf32>
    %30 = arith.mulf %25, %29 : vector<11x11xf32>
    %31 = arith.truncf %30 : vector<11x11xf32> to vector<11x11xbf16>
    %cst_12 = arith.constant dense<0.000000e+00> : vector<11x8xf32>
    %32 = tpu.matmul %31, %17, %cst_12 {dimension_numbers = #tpu.dot_dimension_numbers<[1], [0], [0], [1], [0, 0, 1, 1], [], []>} : vector<11x11xbf16>, vector<11x8xbf16>, vector<11x8xf32> -> vector<11x8xf32>
    %33 = vector.extract_strided_slice %11 {offsets = [0, 8], sizes = [11, 8], strides = [1, 1]} : vector<22x96xf32> to vector<11x8xf32>
    %34 = arith.truncf %33 : vector<11x8xf32> to vector<11x8xbf16>
    %35 = vector.extract_strided_slice %11 {offsets = [0, 40], sizes = [11, 8], strides = [1, 1]} : vector<22x96xf32> to vector<11x8xf32>
    %36 = arith.truncf %35 : vector<11x8xf32> to vector<11x8xbf16>
    %37 = vector.extract_strided_slice %11 {offsets = [0, 72], sizes = [11, 8], strides = [1, 1]} : vector<22x96xf32> to vector<11x8xf32>
    %38 = arith.truncf %37 : vector<11x8xf32> to vector<11x8xbf16>
    %cst_13 = arith.constant dense<0.000000e+00> : vector<11x11xf32>
    %39 = tpu.matmul %34, %36, %cst_13 {dimension_numbers = #tpu.dot_dimension_numbers<[1], [1], [0], [0], [0, 0, 1, 0], [], []>} : vector<11x8xbf16>, vector<11x8xbf16>, vector<11x11xf32> -> vector<11x11xf32>
    %cst_14 = arith.constant 0.353553385 : f32
    %40 = vector.broadcast %cst_14 : f32 to vector<11x11xf32>
    %41 = arith.mulf %39, %40 : vector<11x11xf32>
    %cst_15 = arith.constant dense<0xFF800000> : vector<11xf32>
    %42 = vector.multi_reduction <maximumf>, %41, %cst_15 [1] : vector<11x11xf32> to vector<11xf32>
    %43 = vector.shape_cast %42 : vector<11xf32> to vector<11x1xf32>
    %44 = vector.broadcast %43 : vector<11x1xf32> to vector<11x11xf32>
    %45 = arith.subf %41, %44 : vector<11x11xf32>
    %46 = math.exp %45 : vector<11x11xf32>
    %cst_16 = arith.constant dense<0.000000e+00> : vector<11xf32>
    %47 = vector.multi_reduction <add>, %46, %cst_16 [1] : vector<11x11xf32> to vector<11xf32>
    %48 = vector.shape_cast %47 : vector<11xf32> to vector<11x1xf32>
    %49 = tpu.reciprocal %48 {approx = true} : vector<11x1xf32> -> vector<11x1xf32>
    %50 = vector.broadcast %49 : vector<11x1xf32> to vector<11x11xf32>
    %51 = arith.mulf %46, %50 : vector<11x11xf32>
    %52 = arith.truncf %51 : vector<11x11xf32> to vector<11x11xbf16>
    %cst_17 = arith.constant dense<0.000000e+00> : vector<11x8xf32>
    %53 = tpu.matmul %52, %38, %cst_17 {dimension_numbers = #tpu.dot_dimension_numbers<[1], [0], [0], [1], [0, 0, 1, 1], [], []>} : vector<11x11xbf16>, vector<11x8xbf16>, vector<11x8xf32> -> vector<11x8xf32>
    %54 = vector.extract_strided_slice %11 {offsets = [0, 16], sizes = [11, 8], strides = [1, 1]} : vector<22x96xf32> to vector<11x8xf32>
    %55 = arith.truncf %54 : vector<11x8xf32> to vector<11x8xbf16>
    %56 = vector.extract_strided_slice %11 {offsets = [0, 48], sizes = [11, 8], strides = [1, 1]} : vector<22x96xf32> to vector<11x8xf32>
    %57 = arith.truncf %56 : vector<11x8xf32> to vector<11x8xbf16>
    %58 = vector.extract_strided_slice %11 {offsets = [0, 80], sizes = [11, 8], strides = [1, 1]} : vector<22x96xf32> to vector<11x8xf32>
    %59 = arith.truncf %58 : vector<11x8xf32> to vector<11x8xbf16>
    %cst_18 = arith.constant dense<0.000000e+00> : vector<11x11xf32>
    %60 = tpu.matmul %55, %57, %cst_18 {dimension_numbers = #tpu.dot_dimension_numbers<[1], [1], [0], [0], [0, 0, 1, 0], [], []>} : vector<11x8xbf16>, vector<11x8xbf16>, vector<11x11xf32> -> vector<11x11xf32>
    %cst_19 = arith.constant 0.353553385 : f32
    %61 = vector.broadcast %cst_19 : f32 to vector<11x11xf32>
    %62 = arith.mulf %60, %61 : vector<11x11xf32>
    %cst_20 = arith.constant dense<0xFF800000> : vector<11xf32>
    %63 = vector.multi_reduction <maximumf>, %62, %cst_20 [1] : vector<11x11xf32> to vector<11xf32>
    %64 = vector.shape_cast %63 : vector<11xf32> to vector<11x1xf32>
    %65 = vector.broadcast %64 : vector<11x1xf32> to vector<11x11xf32>
    %66 = arith.subf %62, %65 : vector<11x11xf32>
    %67 = math.exp %66 : vector<11x11xf32>
    %cst_21 = arith.constant dense<0.000000e+00> : vector<11xf32>
    %68 = vector.multi_reduction <add>, %67, %cst_21 [1] : vector<11x11xf32> to vector<11xf32>
    %69 = vector.shape_cast %68 : vector<11xf32> to vector<11x1xf32>
    %70 = tpu.reciprocal %69 {approx = true} : vector<11x1xf32> -> vector<11x1xf32>
    %71 = vector.broadcast %70 : vector<11x1xf32> to vector<11x11xf32>
    %72 = arith.mulf %67, %71 : vector<11x11xf32>
    %73 = arith.truncf %72 : vector<11x11xf32> to vector<11x11xbf16>
    %cst_22 = arith.constant dense<0.000000e+00> : vector<11x8xf32>
    %74 = tpu.matmul %73, %59, %cst_22 {dimension_numbers = #tpu.dot_dimension_numbers<[1], [0], [0], [1], [0, 0, 1, 1], [], []>} : vector<11x11xbf16>, vector<11x8xbf16>, vector<11x8xf32> -> vector<11x8xf32>
    %75 = vector.extract_strided_slice %11 {offsets = [0, 24], sizes = [11, 8], strides = [1, 1]} : vector<22x96xf32> to vector<11x8xf32>
    %76 = arith.truncf %75 : vector<11x8xf32> to vector<11x8xbf16>
    %77 = vector.extract_strided_slice %11 {offsets = [0, 56], sizes = [11, 8], strides = [1, 1]} : vector<22x96xf32> to vector<11x8xf32>
    %78 = arith.truncf %77 : vector<11x8xf32> to vector<11x8xbf16>
    %79 = vector.extract_strided_slice %11 {offsets = [0, 88], sizes = [11, 8], strides = [1, 1]} : vector<22x96xf32> to vector<11x8xf32>
    %80 = arith.truncf %79 : vector<11x8xf32> to vector<11x8xbf16>
    %cst_23 = arith.constant dense<0.000000e+00> : vector<11x11xf32>
    %81 = tpu.matmul %76, %78, %cst_23 {dimension_numbers = #tpu.dot_dimension_numbers<[1], [1], [0], [0], [0, 0, 1, 0], [], []>} : vector<11x8xbf16>, vector<11x8xbf16>, vector<11x11xf32> -> vector<11x11xf32>
    %cst_24 = arith.constant 0.353553385 : f32
    %82 = vector.broadcast %cst_24 : f32 to vector<11x11xf32>
    %83 = arith.mulf %81, %82 : vector<11x11xf32>
    %cst_25 = arith.constant dense<0xFF800000> : vector<11xf32>
    %84 = vector.multi_reduction <maximumf>, %83, %cst_25 [1] : vector<11x11xf32> to vector<11xf32>
    %85 = vector.shape_cast %84 : vector<11xf32> to vector<11x1xf32>
    %86 = vector.broadcast %85 : vector<11x1xf32> to vector<11x11xf32>
    %87 = arith.subf %83, %86 : vector<11x11xf32>
    %88 = math.exp %87 : vector<11x11xf32>
    %cst_26 = arith.constant dense<0.000000e+00> : vector<11xf32>
    %89 = vector.multi_reduction <add>, %88, %cst_26 [1] : vector<11x11xf32> to vector<11xf32>
    %90 = vector.shape_cast %89 : vector<11xf32> to vector<11x1xf32>
    %91 = tpu.reciprocal %90 {approx = true} : vector<11x1xf32> -> vector<11x1xf32>
    %92 = vector.broadcast %91 : vector<11x1xf32> to vector<11x11xf32>
    %93 = arith.mulf %88, %92 : vector<11x11xf32>
    %94 = arith.truncf %93 : vector<11x11xf32> to vector<11x11xbf16>
    %cst_27 = arith.constant dense<0.000000e+00> : vector<11x8xf32>
    %95 = tpu.matmul %94, %80, %cst_27 {dimension_numbers = #tpu.dot_dimension_numbers<[1], [0], [0], [1], [0, 0, 1, 1], [], []>} : vector<11x11xbf16>, vector<11x8xbf16>, vector<11x8xf32> -> vector<11x8xf32>
    %96 = tpu.concatenate %32, %53, %74, %95 in 1 : vector<11x8xf32>, vector<11x8xf32>, vector<11x8xf32>, vector<11x8xf32> -> vector<11x32xf32>
    %97 = vector.extract_strided_slice %11 {offsets = [11, 0], sizes = [11, 8], strides = [1, 1]} : vector<22x96xf32> to vector<11x8xf32>
    %98 = arith.truncf %97 : vector<11x8xf32> to vector<11x8xbf16>
    %99 = vector.extract_strided_slice %11 {offsets = [11, 32], sizes = [11, 8], strides = [1, 1]} : vector<22x96xf32> to vector<11x8xf32>
    %100 = arith.truncf %99 : vector<11x8xf32> to vector<11x8xbf16>
    %101 = vector.extract_strided_slice %11 {offsets = [11, 64], sizes = [11, 8], strides = [1, 1]} : vector<22x96xf32> to vector<11x8xf32>
    %102 = arith.truncf %101 : vector<11x8xf32> to vector<11x8xbf16>
    %cst_28 = arith.constant dense<0.000000e+00> : vector<11x11xf32>
    %103 = tpu.matmul %98, %100, %cst_28 {dimension_numbers = #tpu.dot_dimension_numbers<[1], [1], [0], [0], [0, 0, 1, 0], [], []>} : vector<11x8xbf16>, vector<11x8xbf16>, vector<11x11xf32> -> vector<11x11xf32>
    %cst_29 = arith.constant 0.353553385 : f32
    %104 = vector.broadcast %cst_29 : f32 to vector<11x11xf32>
    %105 = arith.mulf %103, %104 : vector<11x11xf32>
    %cst_30 = arith.constant dense<0xFF800000> : vector<11xf32>
    %106 = vector.multi_reduction <maximumf>, %105, %cst_30 [1] : vector<11x11xf32> to vector<11xf32>
    %107 = vector.shape_cast %106 : vector<11xf32> to vector<11x1xf32>
    %108 = vector.broadcast %107 : vector<11x1xf32> to vector<11x11xf32>
    %109 = arith.subf %105, %108 : vector<11x11xf32>
    %110 = math.exp %109 : vector<11x11xf32>
    %cst_31 = arith.constant dense<0.000000e+00> : vector<11xf32>
    %111 = vector.multi_reduction <add>, %110, %cst_31 [1] : vector<11x11xf32> to vector<11xf32>
    %112 = vector.shape_cast %111 : vector<11xf32> to vector<11x1xf32>
    %113 = tpu.reciprocal %112 {approx = true} : vector<11x1xf32> -> vector<11x1xf32>
    %114 = vector.broadcast %113 : vector<11x1xf32> to vector<11x11xf32>
    %115 = arith.mulf %110, %114 : vector<11x11xf32>
    %116 = arith.truncf %115 : vector<11x11xf32> to vector<11x11xbf16>
    %cst_32 = arith.constant dense<0.000000e+00> : vector<11x8xf32>
    %117 = tpu.matmul %116, %102, %cst_32 {dimension_numbers = #tpu.dot_dimension_numbers<[1], [0], [0], [1], [0, 0, 1, 1], [], []>} : vector<11x11xbf16>, vector<11x8xbf16>, vector<11x8xf32> -> vector<11x8xf32>
    %118 = vector.extract_strided_slice %11 {offsets = [11, 8], sizes = [11, 8], strides = [1, 1]} : vector<22x96xf32> to vector<11x8xf32>
    %119 = arith.truncf %118 : vector<11x8xf32> to vector<11x8xbf16>
    %120 = vector.extract_strided_slice %11 {offsets = [11, 40], sizes = [11, 8], strides = [1, 1]} : vector<22x96xf32> to vector<11x8xf32>
    %121 = arith.truncf %120 : vector<11x8xf32> to vector<11x8xbf16>
    %122 = vector.extract_strided_slice %11 {offsets = [11, 72], sizes = [11, 8], strides = [1, 1]} : vector<22x96xf32> to vector<11x8xf32>
    %123 = arith.truncf %122 : vector<11x8xf32> to vector<11x8xbf16>
    %cst_33 = arith.constant dense<0.000000e+00> : vector<11x11xf32>
    %124 = tpu.matmul %119, %121, %cst_33 {dimension_numbers = #tpu.dot_dimension_numbers<[1], [1], [0], [0], [0, 0, 1, 0], [], []>} : vector<11x8xbf16>, vector<11x8xbf16>, vector<11x11xf32> -> vector<11x11xf32>
    %cst_34 = arith.constant 0.353553385 : f32
    %125 = vector.broadcast %cst_34 : f32 to vector<11x11xf32>
    %126 = arith.mulf %124, %125 : vector<11x11xf32>
    %cst_35 = arith.constant dense<0xFF800000> : vector<11xf32>
    %127 = vector.multi_reduction <maximumf>, %126, %cst_35 [1] : vector<11x11xf32> to vector<11xf32>
    %128 = vector.shape_cast %127 : vector<11xf32> to vector<11x1xf32>
    %129 = vector.broadcast %128 : vector<11x1xf32> to vector<11x11xf32>
    %130 = arith.subf %126, %129 : vector<11x11xf32>
    %131 = math.exp %130 : vector<11x11xf32>
    %cst_36 = arith.constant dense<0.000000e+00> : vector<11xf32>
    %132 = vector.multi_reduction <add>, %131, %cst_36 [1] : vector<11x11xf32> to vector<11xf32>
    %133 = vector.shape_cast %132 : vector<11xf32> to vector<11x1xf32>
    %134 = tpu.reciprocal %133 {approx = true} : vector<11x1xf32> -> vector<11x1xf32>
    %135 = vector.broadcast %134 : vector<11x1xf32> to vector<11x11xf32>
    %136 = arith.mulf %131, %135 : vector<11x11xf32>
    %137 = arith.truncf %136 : vector<11x11xf32> to vector<11x11xbf16>
    %cst_37 = arith.constant dense<0.000000e+00> : vector<11x8xf32>
    %138 = tpu.matmul %137, %123, %cst_37 {dimension_numbers = #tpu.dot_dimension_numbers<[1], [0], [0], [1], [0, 0, 1, 1], [], []>} : vector<11x11xbf16>, vector<11x8xbf16>, vector<11x8xf32> -> vector<11x8xf32>
    %139 = vector.extract_strided_slice %11 {offsets = [11, 16], sizes = [11, 8], strides = [1, 1]} : vector<22x96xf32> to vector<11x8xf32>
    %140 = arith.truncf %139 : vector<11x8xf32> to vector<11x8xbf16>
    %141 = vector.extract_strided_slice %11 {offsets = [11, 48], sizes = [11, 8], strides = [1, 1]} : vector<22x96xf32> to vector<11x8xf32>
    %142 = arith.truncf %141 : vector<11x8xf32> to vector<11x8xbf16>
    %143 = vector.extract_strided_slice %11 {offsets = [11, 80], sizes = [11, 8], strides = [1, 1]} : vector<22x96xf32> to vector<11x8xf32>
    %144 = arith.truncf %143 : vector<11x8xf32> to vector<11x8xbf16>
    %cst_38 = arith.constant dense<0.000000e+00> : vector<11x11xf32>
    %145 = tpu.matmul %140, %142, %cst_38 {dimension_numbers = #tpu.dot_dimension_numbers<[1], [1], [0], [0], [0, 0, 1, 0], [], []>} : vector<11x8xbf16>, vector<11x8xbf16>, vector<11x11xf32> -> vector<11x11xf32>
    %cst_39 = arith.constant 0.353553385 : f32
    %146 = vector.broadcast %cst_39 : f32 to vector<11x11xf32>
    %147 = arith.mulf %145, %146 : vector<11x11xf32>
    %cst_40 = arith.constant dense<0xFF800000> : vector<11xf32>
    %148 = vector.multi_reduction <maximumf>, %147, %cst_40 [1] : vector<11x11xf32> to vector<11xf32>
    %149 = vector.shape_cast %148 : vector<11xf32> to vector<11x1xf32>
    %150 = vector.broadcast %149 : vector<11x1xf32> to vector<11x11xf32>
    %151 = arith.subf %147, %150 : vector<11x11xf32>
    %152 = math.exp %151 : vector<11x11xf32>
    %cst_41 = arith.constant dense<0.000000e+00> : vector<11xf32>
    %153 = vector.multi_reduction <add>, %152, %cst_41 [1] : vector<11x11xf32> to vector<11xf32>
    %154 = vector.shape_cast %153 : vector<11xf32> to vector<11x1xf32>
    %155 = tpu.reciprocal %154 {approx = true} : vector<11x1xf32> -> vector<11x1xf32>
    %156 = vector.broadcast %155 : vector<11x1xf32> to vector<11x11xf32>
    %157 = arith.mulf %152, %156 : vector<11x11xf32>
    %158 = arith.truncf %157 : vector<11x11xf32> to vector<11x11xbf16>
    %cst_42 = arith.constant dense<0.000000e+00> : vector<11x8xf32>
    %159 = tpu.matmul %158, %144, %cst_42 {dimension_numbers = #tpu.dot_dimension_numbers<[1], [0], [0], [1], [0, 0, 1, 1], [], []>} : vector<11x11xbf16>, vector<11x8xbf16>, vector<11x8xf32> -> vector<11x8xf32>
    %160 = vector.extract_strided_slice %11 {offsets = [11, 24], sizes = [11, 8], strides = [1, 1]} : vector<22x96xf32> to vector<11x8xf32>
    %161 = arith.truncf %160 : vector<11x8xf32> to vector<11x8xbf16>
    %162 = vector.extract_strided_slice %11 {offsets = [11, 56], sizes = [11, 8], strides = [1, 1]} : vector<22x96xf32> to vector<11x8xf32>
    %163 = arith.truncf %162 : vector<11x8xf32> to vector<11x8xbf16>
    %164 = vector.extract_strided_slice %11 {offsets = [11, 88], sizes = [11, 8], strides = [1, 1]} : vector<22x96xf32> to vector<11x8xf32>
    %165 = arith.truncf %164 : vector<11x8xf32> to vector<11x8xbf16>
    %cst_43 = arith.constant dense<0.000000e+00> : vector<11x11xf32>
    %166 = tpu.matmul %161, %163, %cst_43 {dimension_numbers = #tpu.dot_dimension_numbers<[1], [1], [0], [0], [0, 0, 1, 0], [], []>} : vector<11x8xbf16>, vector<11x8xbf16>, vector<11x11xf32> -> vector<11x11xf32>
    %cst_44 = arith.constant 0.353553385 : f32
    %167 = vector.broadcast %cst_44 : f32 to vector<11x11xf32>
    %168 = arith.mulf %166, %167 : vector<11x11xf32>
    %cst_45 = arith.constant dense<0xFF800000> : vector<11xf32>
    %169 = vector.multi_reduction <maximumf>, %168, %cst_45 [1] : vector<11x11xf32> to vector<11xf32>
    %170 = vector.shape_cast %169 : vector<11xf32> to vector<11x1xf32>
    %171 = vector.broadcast %170 : vector<11x1xf32> to vector<11x11xf32>
    %172 = arith.subf %168, %171 : vector<11x11xf32>
    %173 = math.exp %172 : vector<11x11xf32>
    %cst_46 = arith.constant dense<0.000000e+00> : vector<11xf32>
    %174 = vector.multi_reduction <add>, %173, %cst_46 [1] : vector<11x11xf32> to vector<11xf32>
    %175 = vector.shape_cast %174 : vector<11xf32> to vector<11x1xf32>
    %176 = tpu.reciprocal %175 {approx = true} : vector<11x1xf32> -> vector<11x1xf32>
    %177 = vector.broadcast %176 : vector<11x1xf32> to vector<11x11xf32>
    %178 = arith.mulf %173, %177 : vector<11x11xf32>
    %179 = arith.truncf %178 : vector<11x11xf32> to vector<11x11xbf16>
    %cst_47 = arith.constant dense<0.000000e+00> : vector<11x8xf32>
    %180 = tpu.matmul %179, %165, %cst_47 {dimension_numbers = #tpu.dot_dimension_numbers<[1], [0], [0], [1], [0, 0, 1, 1], [], []>} : vector<11x11xbf16>, vector<11x8xbf16>, vector<11x8xf32> -> vector<11x8xf32>
    %181 = tpu.concatenate %117, %138, %159, %180 in 1 : vector<11x8xf32>, vector<11x8xf32>, vector<11x8xf32>, vector<11x8xf32> -> vector<11x32xf32>
    %182 = tpu.concatenate %96, %181 in 0 : vector<11x32xf32>, vector<11x32xf32> -> vector<22x32xf32>
    %183 = arith.truncf %182 : vector<22x32xf32> to vector<22x32xbf16>
    %c0_48 = arith.constant 0 : index
    %c0_49 = arith.constant 0 : index
    %c0_50 = arith.constant 0 : index
    %184 = vector.load %arg9[%c0_48, %c0_49, %c0_50] : memref<1x32x32xbf16, #tpu.memory_space<vmem>>, vector<1x32x32xbf16>
    %185 = vector.shape_cast %184 : vector<1x32x32xbf16> to vector<32x32xbf16>
    %cst_51 = arith.constant dense<0.000000e+00> : vector<22x32xf32>
    %186 = tpu.matmul %183, %185, %cst_51 {dimension_numbers = #tpu.dot_dimension_numbers<[1], [0], [0], [1], [0, 0, 1, 1], [], []>} : vector<22x32xbf16>, vector<32x32xbf16>, vector<22x32xf32> -> vector<22x32xf32>
    %c0_52 = arith.constant 0 : index
    %c0_53 = arith.constant 0 : index
    %c0_54 = arith.constant 0 : index
    %187 = vector.load %arg10[%c0_52, %c0_53, %c0_54] : memref<1x1x32xf32, #tpu.memory_space<vmem>>, vector<1x1x32xf32>
    %188 = vector.shape_cast %187 : vector<1x1x32xf32> to vector<1x32xf32>
    %189 = vector.broadcast %188 : vector<1x32xf32> to vector<22x32xf32>
    %190 = arith.addf %186, %189 : vector<22x32xf32>
    %191 = arith.addf %3, %190 : vector<22x32xf32>
    %c0_55 = arith.constant 0 : index
    %c0_56 = arith.constant 0 : index
    %c0_57 = arith.constant 0 : index
    %192 = vector.load %arg11[%c0_55, %c0_56, %c0_57] : memref<1x1x32xf32, #tpu.memory_space<vmem>>, vector<1x1x32xf32>
    %193 = vector.shape_cast %192 : vector<1x1x32xf32> to vector<1x32xf32>
    %c0_58 = arith.constant 0 : index
    %c0_59 = arith.constant 0 : index
    %c0_60 = arith.constant 0 : index
    %194 = vector.load %arg12[%c0_58, %c0_59, %c0_60] : memref<1x1x32xf32, #tpu.memory_space<vmem>>, vector<1x1x32xf32>
    %195 = vector.shape_cast %194 : vector<1x1x32xf32> to vector<1x32xf32>
    %cst_61 = arith.constant dense<0.000000e+00> : vector<22xf32>
    %196 = vector.multi_reduction <add>, %191, %cst_61 [1] : vector<22x32xf32> to vector<22xf32>
    %197 = vector.shape_cast %196 : vector<22xf32> to vector<22x1xf32>
    %cst_62 = arith.constant 3.200000e+01 : f32
    %198 = vector.broadcast %cst_62 : f32 to vector<22x1xf32>
    %199 = arith.divf %197, %198 : vector<22x1xf32>
    %200 = vector.broadcast %199 : vector<22x1xf32> to vector<22x32xf32>
    %201 = arith.subf %191, %200 : vector<22x32xf32>
    %202 = arith.mulf %201, %201 : vector<22x32xf32>
    %cst_63 = arith.constant dense<0.000000e+00> : vector<22xf32>
    %203 = vector.multi_reduction <add>, %202, %cst_63 [1] : vector<22x32xf32> to vector<22xf32>
    %204 = vector.shape_cast %203 : vector<22xf32> to vector<22x1xf32>
    %cst_64 = arith.constant 3.200000e+01 : f32
    %205 = vector.broadcast %cst_64 : f32 to vector<22x1xf32>
    %206 = arith.divf %204, %205 : vector<22x1xf32>
    %207 = vector.broadcast %199 : vector<22x1xf32> to vector<22x32xf32>
    %208 = arith.subf %191, %207 : vector<22x32xf32>
    %cst_65 = arith.constant 9.99999974E-6 : f32
    %209 = vector.broadcast %cst_65 : f32 to vector<22x1xf32>
    %210 = arith.addf %206, %209 : vector<22x1xf32>
    %211 = math.rsqrt %210 : vector<22x1xf32>
    %212 = vector.broadcast %211 : vector<22x1xf32> to vector<22x32xf32>
    %213 = arith.mulf %208, %212 : vector<22x32xf32>
    %214 = vector.broadcast %193 : vector<1x32xf32> to vector<22x32xf32>
    %215 = arith.mulf %213, %214 : vector<22x32xf32>
    %216 = vector.broadcast %195 : vector<1x32xf32> to vector<22x32xf32>
    %217 = arith.addf %215, %216 : vector<22x32xf32>
    %218 = arith.truncf %217 : vector<22x32xf32> to vector<22x32xbf16>
    %c0_66 = arith.constant 0 : index
    %c0_67 = arith.constant 0 : index
    %c0_68 = arith.constant 0 : index
    %219 = vector.load %arg13[%c0_66, %c0_67, %c0_68] : memref<1x32x32xbf16, #tpu.memory_space<vmem>>, vector<1x32x32xbf16>
    %220 = vector.shape_cast %219 : vector<1x32x32xbf16> to vector<32x32xbf16>
    %cst_69 = arith.constant dense<0.000000e+00> : vector<22x32xf32>
    %221 = tpu.matmul %218, %220, %cst_69 {dimension_numbers = #tpu.dot_dimension_numbers<[1], [0], [0], [1], [0, 0, 1, 1], [], []>} : vector<22x32xbf16>, vector<32x32xbf16>, vector<22x32xf32> -> vector<22x32xf32>
    %c0_70 = arith.constant 0 : index
    %c0_71 = arith.constant 0 : index
    %c0_72 = arith.constant 0 : index
    %222 = vector.load %arg14[%c0_70, %c0_71, %c0_72] : memref<1x1x32xf32, #tpu.memory_space<vmem>>, vector<1x1x32xf32>
    %223 = vector.shape_cast %222 : vector<1x1x32xf32> to vector<1x32xf32>
    %224 = vector.broadcast %223 : vector<1x32xf32> to vector<22x32xf32>
    %225 = arith.addf %221, %224 : vector<22x32xf32>
    %cst_73 = arith.constant 0.000000e+00 : f32
    %226 = vector.broadcast %cst_73 : f32 to vector<22x32xf32>
    %227 = arith.maximumf %225, %226 : vector<22x32xf32>
    %228 = arith.truncf %227 : vector<22x32xf32> to vector<22x32xbf16>
    %c0_74 = arith.constant 0 : index
    %c0_75 = arith.constant 0 : index
    %c0_76 = arith.constant 0 : index
    %229 = vector.load %arg15[%c0_74, %c0_75, %c0_76] : memref<1x32x32xbf16, #tpu.memory_space<vmem>>, vector<1x32x32xbf16>
    %230 = vector.shape_cast %229 : vector<1x32x32xbf16> to vector<32x32xbf16>
    %cst_77 = arith.constant dense<0.000000e+00> : vector<22x32xf32>
    %231 = tpu.matmul %228, %230, %cst_77 {dimension_numbers = #tpu.dot_dimension_numbers<[1], [0], [0], [1], [0, 0, 1, 1], [], []>} : vector<22x32xbf16>, vector<32x32xbf16>, vector<22x32xf32> -> vector<22x32xf32>
    %c0_78 = arith.constant 0 : index
    %c0_79 = arith.constant 0 : index
    %c0_80 = arith.constant 0 : index
    %232 = vector.load %arg16[%c0_78, %c0_79, %c0_80] : memref<1x1x32xf32, #tpu.memory_space<vmem>>, vector<1x1x32xf32>
    %233 = vector.shape_cast %232 : vector<1x1x32xf32> to vector<1x32xf32>
    %234 = vector.broadcast %233 : vector<1x32xf32> to vector<22x32xf32>
    %235 = arith.addf %231, %234 : vector<22x32xf32>
    %236 = arith.addf %217, %235 : vector<22x32xf32>
    %c0_81 = arith.constant 0 : index
    %c0_82 = arith.constant 0 : index
    %c0_83 = arith.constant 0 : index
    %237 = vector.load %arg17[%c0_81, %c0_82, %c0_83] : memref<1x1x32xf32, #tpu.memory_space<vmem>>, vector<1x1x32xf32>
    %238 = vector.shape_cast %237 : vector<1x1x32xf32> to vector<1x32xf32>
    %c0_84 = arith.constant 0 : index
    %c0_85 = arith.constant 0 : index
    %c0_86 = arith.constant 0 : index
    %239 = vector.load %arg18[%c0_84, %c0_85, %c0_86] : memref<1x1x32xf32, #tpu.memory_space<vmem>>, vector<1x1x32xf32>
    %240 = vector.shape_cast %239 : vector<1x1x32xf32> to vector<1x32xf32>
    %cst_87 = arith.constant dense<0.000000e+00> : vector<22xf32>
    %241 = vector.multi_reduction <add>, %236, %cst_87 [1] : vector<22x32xf32> to vector<22xf32>
    %242 = vector.shape_cast %241 : vector<22xf32> to vector<22x1xf32>
    %cst_88 = arith.constant 3.200000e+01 : f32
    %243 = vector.broadcast %cst_88 : f32 to vector<22x1xf32>
    %244 = arith.divf %242, %243 : vector<22x1xf32>
    %245 = vector.broadcast %244 : vector<22x1xf32> to vector<22x32xf32>
    %246 = arith.subf %236, %245 : vector<22x32xf32>
    %247 = arith.mulf %246, %246 : vector<22x32xf32>
    %cst_89 = arith.constant dense<0.000000e+00> : vector<22xf32>
    %248 = vector.multi_reduction <add>, %247, %cst_89 [1] : vector<22x32xf32> to vector<22xf32>
    %249 = vector.shape_cast %248 : vector<22xf32> to vector<22x1xf32>
    %cst_90 = arith.constant 3.200000e+01 : f32
    %250 = vector.broadcast %cst_90 : f32 to vector<22x1xf32>
    %251 = arith.divf %249, %250 : vector<22x1xf32>
    %252 = vector.broadcast %244 : vector<22x1xf32> to vector<22x32xf32>
    %253 = arith.subf %236, %252 : vector<22x32xf32>
    %cst_91 = arith.constant 9.99999974E-6 : f32
    %254 = vector.broadcast %cst_91 : f32 to vector<22x1xf32>
    %255 = arith.addf %251, %254 : vector<22x1xf32>
    %256 = math.rsqrt %255 : vector<22x1xf32>
    %257 = vector.broadcast %256 : vector<22x1xf32> to vector<22x32xf32>
    %258 = arith.mulf %253, %257 : vector<22x32xf32>
    %259 = vector.broadcast %238 : vector<1x32xf32> to vector<22x32xf32>
    %260 = arith.mulf %258, %259 : vector<22x32xf32>
    %261 = vector.broadcast %240 : vector<1x32xf32> to vector<22x32xf32>
    %262 = arith.addf %260, %261 : vector<22x32xf32>
    %c0_92 = arith.constant 0 : index
    %c0_93 = arith.constant 0 : index
    %263 = vector.load %arg22[%c0_92, %c0_93] : memref<22x32xf32, #tpu.memory_space<vmem>>, vector<22x32xf32>
    tpu.vector_store %arg22[%c0_92, %c0_93], %262 {strides = array<i32>} : memref<22x32xf32, #tpu.memory_space<vmem>>, vector<22x32xf32>,
    %c1_i32 = arith.constant 1 : i32
    %264 = arith.cmpi eq, %arg0, %c1_i32 : i32
    %265 = arith.extui %264 : i1 to i32
    %c0_i32_94 = arith.constant 0 : i32
    %266 = arith.cmpi ne, %265, %c0_i32_94 : i32
    scf.if %266 {
      %c0_95 = arith.constant 0 : index
      %c0_96 = arith.constant 0 : index
      %267 = vector.load %arg19[%c0_95, %c0_96] : memref<1x32xf32, #tpu.memory_space<vmem>>, vector<1x32xf32>
      %cst_97 = arith.constant dense<0.000000e+00> : vector<1x22xf32>
      %268 = tpu.matmul %267, %262, %cst_97 {dimension_numbers = #tpu.dot_dimension_numbers<[1], [1], [0], [0], [0, 0, 1, 0], [], []>} : vector<1x32xf32>, vector<22x32xf32>, vector<1x22xf32> -> vector<1x22xf32>
      %c0_98 = arith.constant 0 : index
      %c0_99 = arith.constant 0 : index
      %269 = vector.load %arg20[%c0_98, %c0_99] : memref<1x1xf32, #tpu.memory_space<vmem>>, vector<1x1xf32>
      %270 = vector.broadcast %269 : vector<1x1xf32> to vector<1x22xf32>
      %271 = arith.addf %268, %270 : vector<1x22xf32>
      %cst_100 = arith.constant 0.000000e+00 : f32
      %272 = vector.broadcast %cst_100 : f32 to vector<1x106xf32>
      %273 = tpu.concatenate %271, %272 in 1 : vector<1x22xf32>, vector<1x106xf32> -> vector<1x128xf32>
      %c0_101 = arith.constant 0 : index
      %c0_102 = arith.constant 0 : index
      %274 = vector.load %arg21[%c0_101, %c0_102] : memref<1x128xf32, #tpu.memory_space<vmem>>, vector<1x128xf32>
      tpu.vector_store %arg21[%c0_101, %c0_102], %273 {strides = array<i32>} : memref<1x128xf32, #tpu.memory_space<vmem>>, vector<1x128xf32>,
    } else {
    }
    return
  }
  func.func @transform_0(%arg0: i32) -> (i32, i32) {
    %c0_i32 = arith.constant 0 : i32
    %c0_i32_0 = arith.constant 0 : i32
    %c0_i32_1 = arith.constant 0 : i32
    return %c0_i32, %c0_i32_0 : i32, i32
  }
  func.func @transform_1(%arg0: i32) -> (i32, i32) {
    %c0_i32 = arith.constant 0 : i32
    %c0_i32_0 = arith.constant 0 : i32
    %c0_i32_1 = arith.constant 0 : i32
    return %c0_i32, %c0_i32_0 : i32, i32
  }
  func.func @transform_2(%arg0: i32) -> (i32, i32) {
    %c0_i32 = arith.constant 0 : i32
    %c0_i32_0 = arith.constant 0 : i32
    %c0_i32_1 = arith.constant 0 : i32
    return %c0_i32, %c0_i32_0 : i32, i32
  }
  func.func @transform_3(%arg0: i32) -> (i32, i32) {
    %c0_i32 = arith.constant 0 : i32
    %c0_i32_0 = arith.constant 0 : i32
    %c0_i32_1 = arith.constant 0 : i32
    return %c0_i32, %c0_i32_0 : i32, i32
  }
  func.func @transform_4(%arg0: i32) -> (i32, i32) {
    %c0_i32 = arith.constant 0 : i32
    %c0_i32_0 = arith.constant 0 : i32
    %c0_i32_1 = arith.constant 0 : i32
    return %c0_i32, %c0_i32_0 : i32, i32
  }
  func.func @transform_5(%arg0: i32) -> (i32, i32) {
    %c0_i32 = arith.constant 0 : i32
    %c0_i32_0 = arith.constant 0 : i32
    %c0_i32_1 = arith.constant 0 : i32
    return %c0_i32, %c0_i32_0 : i32, i32
  }
  func.func @transform_6(%arg0: i32) -> (i32, i32, i32) {
    %c0_i32 = arith.constant 0 : i32
    %c0_i32_0 = arith.constant 0 : i32
    %c0_i32_1 = arith.constant 0 : i32
    return %arg0, %c0_i32, %c0_i32_0 : i32, i32, i32
  }
  func.func @transform_7(%arg0: i32) -> (i32, i32, i32) {
    %c0_i32 = arith.constant 0 : i32
    %c0_i32_0 = arith.constant 0 : i32
    %c0_i32_1 = arith.constant 0 : i32
    return %arg0, %c0_i32, %c0_i32_0 : i32, i32, i32
  }
  func.func @transform_8(%arg0: i32) -> (i32, i32, i32) {
    %c0_i32 = arith.constant 0 : i32
    %c0_i32_0 = arith.constant 0 : i32
    %c0_i32_1 = arith.constant 0 : i32
    return %arg0, %c0_i32, %c0_i32_0 : i32, i32, i32
  }
  func.func @transform_9(%arg0: i32) -> (i32, i32, i32) {
    %c0_i32 = arith.constant 0 : i32
    %c0_i32_0 = arith.constant 0 : i32
    %c0_i32_1 = arith.constant 0 : i32
    return %arg0, %c0_i32, %c0_i32_0 : i32, i32, i32
  }
  func.func @transform_10(%arg0: i32) -> (i32, i32, i32) {
    %c0_i32 = arith.constant 0 : i32
    %c0_i32_0 = arith.constant 0 : i32
    %c0_i32_1 = arith.constant 0 : i32
    return %arg0, %c0_i32, %c0_i32_0 : i32, i32, i32
  }
  func.func @transform_11(%arg0: i32) -> (i32, i32, i32) {
    %c0_i32 = arith.constant 0 : i32
    %c0_i32_0 = arith.constant 0 : i32
    %c0_i32_1 = arith.constant 0 : i32
    return %arg0, %c0_i32, %c0_i32_0 : i32, i32, i32
  }
  func.func @transform_12(%arg0: i32) -> (i32, i32, i32) {
    %c0_i32 = arith.constant 0 : i32
    %c0_i32_0 = arith.constant 0 : i32
    %c0_i32_1 = arith.constant 0 : i32
    return %arg0, %c0_i32, %c0_i32_0 : i32, i32, i32
  }
  func.func @transform_13(%arg0: i32) -> (i32, i32, i32) {
    %c0_i32 = arith.constant 0 : i32
    %c0_i32_0 = arith.constant 0 : i32
    %c0_i32_1 = arith.constant 0 : i32
    return %arg0, %c0_i32, %c0_i32_0 : i32, i32, i32
  }
  func.func @transform_14(%arg0: i32) -> (i32, i32, i32) {
    %c0_i32 = arith.constant 0 : i32
    %c0_i32_0 = arith.constant 0 : i32
    %c0_i32_1 = arith.constant 0 : i32
    return %arg0, %c0_i32, %c0_i32_0 : i32, i32, i32
  }
  func.func @transform_15(%arg0: i32) -> (i32, i32, i32) {
    %c0_i32 = arith.constant 0 : i32
    %c0_i32_0 = arith.constant 0 : i32
    %c0_i32_1 = arith.constant 0 : i32
    return %arg0, %c0_i32, %c0_i32_0 : i32, i32, i32
  }
  func.func @transform_16(%arg0: i32) -> (i32, i32, i32) {
    %c0_i32 = arith.constant 0 : i32
    %c0_i32_0 = arith.constant 0 : i32
    %c0_i32_1 = arith.constant 0 : i32
    return %arg0, %c0_i32, %c0_i32_0 : i32, i32, i32
  }
  func.func @transform_17(%arg0: i32) -> (i32, i32, i32) {
    %c0_i32 = arith.constant 0 : i32
    %c0_i32_0 = arith.constant 0 : i32
    %c0_i32_1 = arith.constant 0 : i32
    return %arg0, %c0_i32, %c0_i32_0 : i32, i32, i32
  }
  func.func @transform_18(%arg0: i32) -> (i32, i32) {
    %c0_i32 = arith.constant 0 : i32
    %c0_i32_0 = arith.constant 0 : i32
    %c0_i32_1 = arith.constant 0 : i32
    return %c0_i32, %c0_i32_0 : i32, i32
  }
  func.func @transform_19(%arg0: i32) -> (i32, i32) {
    %c0_i32 = arith.constant 0 : i32
    %c0_i32_0 = arith.constant 0 : i32
    %c0_i32_1 = arith.constant 0 : i32
    return %c0_i32, %c0_i32_0 : i32, i32
  }
  func.func @transform_20(%arg0: i32) -> (i32, i32) {
    %c0_i32 = arith.constant 0 : i32
    %c0_i32_0 = arith.constant 0 : i32
    %c0_i32_1 = arith.constant 0 : i32
    return %c0_i32, %c0_i32_0 : i32, i32
  }
}

module attributes {stable_mosaic.version = 11 : i64} {
  func.func @_extract_kernel(%arg0: i32, %arg1: i32, %arg2: memref<2x4xi32, #tpu.memory_space<smem>>, %arg3: memref<1x1x4x48xf32, #tpu.memory_space<vmem>>, %arg4: memref<1x1x4x48xf32, #tpu.memory_space<vmem>>) attributes {dimension_semantics = [#tpu.dimension_semantics<arbitrary>, #tpu.dimension_semantics<arbitrary>], iteration_bounds = array<i64: 2, 4>, scalar_prefetch = 1 : i64, scratch_operands = 0 : i64, tpu.core_type = #tpu.core_type<tc>, window_params = [{transform_indices = @transform_0, window_bounds = array<i64: 1, 1, 4, 48>}, {transform_indices = @transform_1, window_bounds = array<i64: 1, 1, 4, 48>}]} {
    %c0 = arith.constant 0 : index
    %c0_0 = arith.constant 0 : index
    %c0_1 = arith.constant 0 : index
    %c0_2 = arith.constant 0 : index
    %0 = vector.load %arg3[%c0, %c0_0, %c0_1, %c0_2] : memref<1x1x4x48xf32, #tpu.memory_space<vmem>>, vector<1x1x4x48xf32>
    %c0_3 = arith.constant 0 : index
    %c0_4 = arith.constant 0 : index
    %c0_5 = arith.constant 0 : index
    %c0_6 = arith.constant 0 : index
    %1 = vector.load %arg4[%c0_3, %c0_4, %c0_5, %c0_6] : memref<1x1x4x48xf32, #tpu.memory_space<vmem>>, vector<1x1x4x48xf32>
    tpu.vector_store %arg4[%c0_3, %c0_4, %c0_5, %c0_6], %0 {strides = array<i32>} : memref<1x1x4x48xf32, #tpu.memory_space<vmem>>, vector<1x1x4x48xf32>,
    return
  }
  func.func @transform_0(%arg0: i32, %arg1: i32, %arg2: memref<2x4xi32, #tpu.memory_space<smem>>) -> (i32, i32, i32, i32) {
    %0 = arith.index_cast %arg0 : i32 to index
    %1 = arith.index_cast %arg1 : i32 to index
    %2 = memref.load %arg2[%0, %1] : memref<2x4xi32, #tpu.memory_space<smem>>
    %c0_i32 = arith.constant 0 : i32
    %c0_i32_0 = arith.constant 0 : i32
    %c0_i32_1 = arith.constant 0 : i32
    return %arg0, %2, %c0_i32, %c0_i32_0 : i32, i32, i32, i32
  }
  func.func @transform_1(%arg0: i32, %arg1: i32, %arg2: memref<2x4xi32, #tpu.memory_space<smem>>) -> (i32, i32, i32, i32) {
    %c0_i32 = arith.constant 0 : i32
    %c0_i32_0 = arith.constant 0 : i32
    %c0_i32_1 = arith.constant 0 : i32
    return %arg0, %arg1, %c0_i32, %c0_i32_0 : i32, i32, i32, i32
  }
}

</mosaic_0001>

<bundles_post_ra>
// kernel: squeeze.7
= control target key start
LH: loop header
LB: loop body
LE: loop exit
PB: predicated region body
PF: predicated region fallthrough
CT: control target
= control target key end

     0   :  { %vm7_vm0 = vcmask 89088   ;;  %s39_s0 = inlined_call_operand.vmem [shape: f32[22], index: 0, kind: input, shape index: {}]   ;;  %s40_s1 = inlined_call_operand.vmem [shape: f32[2,11], index: 1, kind: output, shape index: {}]  }
   0x1   :  { %v4_v0 = vld [vmem:[%s39_s0] sm:$0x1]  ;;  %s22_s0 = smov 117  }
   0x2   :  { %5 = vst [vmem:[#allocation1] sm:$0x1] %v4_v0 }
   0x9   :  { %v9_v1 = vld [vmem:[#allocation1] sm:$0x1]  }
   0xa   :  { %v6_v2 = vld [vmem:[#allocation1] sm:$0x1]   ;;  %10 = vrot.lane.b32.xlu0 %v9_v1, %s22_s0 }
   0xb   :  { %8 = vst.msk [vmem:[#allocation0] sm:$0x1] %vm7_vm0, %v6_v2  }
  0x7c   :  { %v11_v3 = vpop.permute.xlu0 %10  }
  0x7d   :  { %14 = vst.msk [vmem:[#allocation0 + $0x1] sm:$0x1] %vm7_vm0, %v11_v3  }
  0x84   :  { %v18_v4 = vld [vmem:[#allocation0] sm:$0x3] }
  0x85   :  { %20 = vst [vmem:[%s40_s1] sm:$0x3] %v18_v4 }

// kernel: topk_selector_forward.3
= control target key start
LH: loop header
LB: loop body
LE: loop exit
PB: predicated region body
PF: predicated region fallthrough
CT: control target
= control target key end

     0   :  { %s656_s0 = inlined_call_operand.vmem [shape: s32[2,4], index: 0, kind: input, shape index: {}]   ;;  %s657_s1 = inlined_call_operand.vmem [shape: f32[2,8,4,48], index: 1, kind: input, shape index: {}]   ;;  %s658_s2 = inlined_call_operand.hbm [shape: f32[2,4,4,48], index: 2, kind: output, shape index: {}]  }
   0x1   :  { %s7_s11 = sshll.u32 %s656_s0, 4  ;;  %s8_s11 = int_to_ptr.vmem [resolvable:$true] %s7_s11 }
   0x2   :  { %s388_s12 = scalar_lea.vmem %s8_s11, 32  ;;  %p393_p1 = scmp.lt.s32.totalorder %s8_s11, %s8_s11 }
   0x3   :  { %p389_p0 = scmp.ne.s32.totalorder %s8_s11, %s388_s12  ;;  %p394_p2 = scmp.lt.s32.totalorder %s388_s12, %s388_s12 }
   0x5   :  { %p395_p3 = por %p394_p2, %p393_p1 }
   0x7   :  { %p396_p4 = pnand %p395_p3, %p389_p0 }
   0x9   :  { %399 = shalt.err (!%p396_p4)  }
   0xa   :  { %s498_s13 = smov [#allocation3]  }
   0xb   :  { %10 = dma.vmem_to_smem %s8_s11, 32, %s498_s13, [#allocation2] }
   0xc   :  { %460 = dma.done.wait [#allocation2], 32 }
   0xd   :  { %461 = vsyncadd [#allocation2], 4294967264 }
   0xe   :  { %12 = sfence }
   0xf   :  { %13 = vsyncpa [#allocation5], 0 }
  0x10   :  { %15 = vsyncpa [#allocation5 + $0x1], 0  ;;  %s518_s14 = smov 0   ;;  %s520_s15 = smov 0  }
  0x11   :  { %s522_s0 = smov 0   ;;  %s524_s16 = smov 0  }
  0x12   :  { %s526_s17 = smov 0   ;;  %s528_s18 = smov 0  }
  0x13   :  { %s530_s19 = smov 0   ;;  %s532_s20 = smov 0  }
  0x14 LB: > { %s300_s21 = sadd.s32 4294967295, %s496_s20   ;;  %s301_s22 = sadd.s32 4294967294, %s496_s20   ;;  %s496_s20 = sphi %s532_s20, %s21_s20   ;;  %s492_s19 = sphi %s530_s19, %s667_s19   ;;  %s488_s18 = sphi %s528_s18, %s666_s18   ;;  %s484_s17 = sphi %s526_s17, %s665_s17   ;;  %s480_s16 = sphi %s524_s16, %s664_s16   ;;  %s476_s0 = sphi %s522_s0, %s663_s0   ;;  %s472_s15 = sphi %s520_s15, %s662_s15   ;;  %s468_s14 = sphi %s518_s14, %s661_s14  }
  0x15   : > { %s30_s23 = sadd.s32 1, %s488_s18  ;;  %s33_s24 = sadd.s32 1, %s492_s19 }
  0x16   : > { %p31_p5 = scmp.ge.s32.totalorder %s30_s23, 4  ;;  %p96_p6 = scmp.ne.s32.totalorder %s476_s0, %s472_s15 }
  0x17   : > { %p97_p7 = scmp.eq.s32.totalorder %s300_s21, 7  ;;  %p102_p10 = scmp.ne.s32.totalorder %s472_s15, %s468_s14 }
  0x18   : > { %s669_s23 = smov (%p31_p5, %s30_s23), 0  ;;  %s671_s24 = smov (!%p31_p5, %s33_s24), %s492_s19 }
  0x19   : > { %s82_s25 = ssub.s32 %s488_s18, %s669_s23  ;;  %p569_p8 = por %p97_p7, %p96_p6 }
  0x1a   : > { %p35_p9 = scmp.ge.s32.totalorder %s671_s24, 2  ;;  %p103_p11 = scmp.eq.s32.totalorder %s301_s22, 7 }
  0x1b   : > { %p306_p12 = scmp.ge.s32.totalorder %s496_s20, 1  ;;  %p148_p0 = scmp.lt.s32.totalorder %s496_s20, 9 }
  0x1c   : > { %s673_s24 = smov (%p35_p9, %s671_s24), 0  ;;  %p578_p13 = por %p103_p11, %p102_p10 }
  0x1d   : > { %s81_s28 = ssub.s32 %s492_s19, %s673_s24  ;;  %s86_s29 = sadd.s32 1, %s476_s0 }
  0x1e   : > { %s83_s30 = sor.u32 %s82_s25, %s81_s28  ;;  %p149_p1 = pnand %p306_p12, %p148_p0 }
  0x1f   : > { %p84_p2 = scmp.eq.s32.totalorder %s83_s30, 0  ;;  %s179_s4 = sshra.s32 (!%p149_p1), %s480_s16, 7  ;;  %vm204_vm0 = vcmask (!%p149_p1), 388096  }
  0x20   : > { %152 = sbr.rel (%p149_p1) target bundleno = 68 (0x44), region = 24  ;;  %s181_s5 = sadd.s32 (!%p149_p1), %s484_s17, %s179_s4 }
  0x21   : > { %s587_s3 = scalar_select %p84_p2, %s476_s0, %s86_s29  }
  0x22   : > { %s176_s6 = sand.u32 (!%p149_p1), 1, %s472_s15   ;;  %s308_s7 = sshll.u32 (!%p149_p1), %s181_s5, 7 }
  0x23   : > { %s184_s8 = sand.u32 (!%p149_p1), 127, %s480_s16  ;;  %p187_p3 = scmp.lt.s32.totalorder (!%p149_p1), %s484_s17, 1 }
  0x24   : > { %s185_s9 = sadd.s32 (!%p149_p1), %s308_s7, %s184_s8  ;;  %s307_s11 = sshll.u32 (!%p149_p1), %s176_s6, 2 }
  0x25   : > { %s186_s10 = sld [smem:[#allocation3 + %s185_s9]] (!%p149_p1)  ;;  %s312_s13 = sshll.u32 (!%p149_p1), %s484_s17, 2 }
  0x26   : > { %s218_s21 = sadd.s32 (!%p149_p1), %s480_s16, %s312_s13  ;;  %s178_s25 = scalar_lea.vmem (!%p149_p1), [#allocation4], %s307_s11 }
  0x27   : > { %s188_s12 = scalar_select %p187_p3, %s484_s17, 1 }
  0x28   : > { %s222_s28 = sshll.u32 %s178_s25, 4  ;;  %s313_s29 = sshll.u32 %s218_s21, 6  ;;  %s597_s28 = int_to_ptr.vmem [resolvable:$true] %s222_s28 }
  0x29   : > { %s309_s22 = sshll.u32 %s188_s12, 3  ;;  %s605_s9 = scalar_lea.hbm %s658_s2, %s313_s29 }
  0x2a   : > { %s207_s11 = scalar_lea.sflag [#allocation5], %s176_s6  ;;  %s499_s12 = smov [#allocation4]  }
  0x2b   : > { %p189_p4 = scmp.lt.s32.totalorder %s186_s10, 7  ;;  %s404_s13 = sshll.u32 %s499_s12, 4  ;;  %s405_s13 = int_to_ptr.vmem [resolvable:$false] %s404_s13 }
  0x2c   : > { %s406_s21 = scalar_lea.vmem %s405_s13, 128  ;;  %p407_p9 = scmp.lt.s32.totalorder %s597_s28, %s405_s13 }
  0x2d   : > { %s675_s10 = smov (!%p189_p4, %s186_s10), 7 }
  0x2e   : > { %s192_s30 = sadd.s32 %s309_s22, %s675_s10  ;;  %s400_s10 = scalar_lea.vmem %s597_s28, 64 }
  0x2f   : > { %s310_s4 = sshll.u32 %s192_s30, 2  ;;  %p401_p5 = scmp.ne.s32.totalorder %s597_s28, %s400_s10 }
  0x30   : > { %s194_s17 = scalar_lea.vmem %s657_s1, %s310_s4  ;;  %p408_p10 = scmp.lt.s32.totalorder %s406_s21, %s400_s10 }
  0x31   : > { %v203_v0 = vld [vmem:[%s194_s17] sm:$0xf]  ;;  %p402_p6 = pnand %p401_p5, %p569_p8 }
  0x32   : > { %205 = vst.msk [vmem:[%s178_s25] sm:$0xf] %vm204_vm0, %v203_v0  ;;  %p409_p11 = por %p408_p10, %p407_p9 }
  0x33   : > { %p403_p7 = pneg %p402_p6 }
  0x35   : > { %p410_p12 = pnand %p409_p11, %p403_p7 }
  0x37   : > { %413 = shalt.err (!%p410_p12)
}
  0x38   : > { %s414_s6 = scalar_lea.hbm %s605_s9, 64  ;;  %s418_s29 = scalar_lea.hbm %s658_s2, 512 }
  0x39   : > { %p415_p0 = scmp.ne.s32.totalorder %s605_s9, %s414_s6  ;;  %p419_p3 = scmp.lt.u32.totalorder %s605_s9, %s658_s2 }
  0x3a   : > { %p420_p4 = scmp.lt.u32.totalorder %s418_s29, %s414_s6  ;;  %p422_p6 = scmp.lt.u32.totalorder %s414_s6, %s605_s9 }
  0x3b   : > { %p416_p1 = pnand %p415_p0, %p569_p8 }
  0x3c   : > { %p421_p5 = por %p420_p4, %p419_p3 }
  0x3d   : > { %p417_p2 = pneg %p416_p1 }
  0x3e   : > { %p423_p7 = por %p422_p6, %p421_p5 }
  0x40   : > { %p424_p9 = pnand %p423_p7, %p417_p2 }
  0x42   : > { %427 = shalt.err (!%p424_p9)
}
  0x43   : > { %316 = dma.vmem_to_hbm [thread:$0]  (%p569_p8), %s597_s28, 64, %s605_s9, %s207_s11  }
  0x44 PF: > { %p322_p10 = scmp.ge.s32.totalorder %s496_s20, 2  ;;  %s234_s5 = sand.u32 1, %s468_s14  }
  0x45   : > { %s235_s7 = scalar_lea.sflag [#allocation5], %s234_s5 }
  0x46   : > { %p319_p11 = pnand %p322_p10, %p578_p13 }
  0x48   : > { %463 = dma.done.wait (!%p319_p11), %s235_s7, 64  }
  0x49   : > { %465 = vsyncadd (!%p319_p11), %s235_s7, 4294967232  ;;  %s21_s20 = sadd.s32 1, %s496_s20   ;;  %s661_s14 = smov %s472_s15 }
  0x4a   : > { %p18_p12 = scmp.ge.s32.totalorder %s21_s20, 10   ;;  %s662_s15 = smov %s476_s0 }
  0x4b   : > { %s663_s0 = smov %s587_s3  ;;  %s664_s16 = smov %s488_s18 }
  0x4c   : > { %s665_s17 = smov %s492_s19  ;;  %s666_s18 = smov %s669_s23 }
  0x4d   : > { %s667_s19 = smov %s673_s24  ;;  %20 = sbr.rel (!%p18_p12) target bundleno = 20 (0x14), region = 59 }
  0x54   :  { %240 = vsyncpa [#allocation5], 1 }
  0x55   :  { %242 = vsyncpa [#allocation5 + $0x1], 1 }

// kernel: topk_selector_forward.2
= control target key start
LH: loop header
LB: loop body
LE: loop exit
PB: predicated region body
PF: predicated region fallthrough
CT: control target
= control target key end

     0   :  { %s3346_s23 = smov 0   ;;  %s3834_s0 = inlined_call_operand.vmem [shape: bf16[6,64], index: 0, kind: input, shape index: {}]   ;;  %s3835_s1 = inlined_call_operand.vmem [shape: bf16[16,48], index: 1, kind: input, shape index: {}]   ;;  %s3836_s2 = inlined_call_operand.vmem [shape: bf16[64,32], index: 2, kind: input, shape index: {}]   ;;  %s3837_s3 = inlined_call_operand.vmem [shape: f32[1,32], index: 3, kind: input, shape index: {}]   ;;  %s3838_s4 = inlined_call_operand.vmem [shape: bf16[48,32], index: 4, kind: input, shape index: {}]   ;;  %s3839_s5 = inlined_call_operand.vmem [shape: f32[1,32], index: 5, kind: input, shape index: {}]   ;;  %s3840_s6 = inlined_call_operand.vmem [shape: bf16[2,32,96], index: 6, kind: input, shape index: {}]   ;;  %s3841_s7 = inlined_call_operand.vmem [shape: f32[2,1,96], index: 7, kind: input, shape index: {}]   ;;  %s3842_s8 = inlined_call_operand.vmem [shape: bf16[2,32,32], index: 8, kind: input, shape index: {}]   ;;  %s3843_s9 = inlined_call_operand.vmem [shape: f32[2,1,32], index: 9, kind: input, shape index: {}]   ;;  %s3844_s10 = inlined_call_operand.vmem [shape: f32[2,1,32], index: 10, kind: input, shape index: {}]   ;;  %s3845_s11 = inlined_call_operand.vmem [shape: f32[2,1,32], index: 11, kind: input, shape index: {}]   ;;  %s3846_s12 = inlined_call_operand.vmem [shape: bf16[2,32,32], index: 12, kind: input, shape index: {}]   ;;  %s3847_s13 = inlined_call_operand.vmem [shape: f32[2,1,32], index: 13, kind: input, shape index: {}]   ;;  %s3848_s14 = inlined_call_operand.vmem [shape: bf16[2,32,32], index: 14, kind: input, shape index: {}]   ;;  %s3849_s15 = inlined_call_operand.vmem [shape: f32[2,1,32], index: 15, kind: input, shape index: {}]   ;;  %s3850_s16 = inlined_call_operand.vmem [shape: f32[2,1,32], index: 16, kind: input, shape index: {}]   ;;  %s3851_s17 = inlined_call_operand.vmem [shape: f32[2,1,32], index: 17, kind: input, shape index: {}]   ;;  %s3852_s18 = inlined_call_operand.vmem [shape: f32[1,32], index: 18, kind: input, shape index: {}]   ;;  %s3853_s19 = inlined_call_operand.<no memory space> [shape: f32[1,1], index: 19, kind: input, shape index: {}]   ;;  %s3854_s20 = inlined_call_operand.vmem [shape: f32[1,128], index: 20, kind: output, shape index: {}]  }
   0x1   :  { %3859 = sst [smem:[#allocation6_spill]] %s3834_s0  ;;  %v25_v0 = vstv %s3853_s19 }
   0x2   :  { %3860 = sst [smem:[#allocation7_spill]] %s3835_s1  ;;  %26 = vst [vmem:[#allocation3] sm:$0x1] %v25_v0 }
   0x3   :  { %3861 = sst [smem:[#allocation8_spill]] %s3836_s2 }
   0x4   :  { %3862 = sst [smem:[#allocation9_spill]] %s3837_s3 }
   0x5   :  { %3863 = sst [smem:[#allocation10_spill]] %s3838_s4 }
   0x6   :  { %3864 = sst [smem:[#allocation11_spill]] %s3840_s6 }
   0x7   :  { %3865 = sst [smem:[#allocation12_spill]] %s3842_s8 }
   0x8   :  { %3866 = sst [smem:[#allocation13_spill]] %s3852_s18 }
   0x9   :  { %3867 = sst [smem:[#allocation14_spill]] %s3854_s20 }
   0xa LB: > { %3868 = sst [smem:[#allocation4_spill]] %s3213_s23  ;;  %s3352_s24 = sadd.s32 4294967295, %s3213_s23   ;;  %s3213_s23 = sphi %s3346_s23, %s32_s23  }
   0xb   : > { %p2753_p0 = scmp.ge.s32.totalorder %s3213_s23, 1  ;;  %p653_p1 = scmp.lt.s32.totalorder %s3213_s23, 3 }
   0xd   : > { %p654_p2 = pnand %p2753_p0, %p653_p1 }
   0xf   : > { %657 = sbr.rel (%p654_p2) target bundleno = 3146 (0xc4a), region = 100 }
  0x16   : > { %p745_p3 = scmp.lt.s32.totalorder %s3352_s24, 1  ;;  %s3869_s6 = sld [smem:[#allocation11_spill]] }
  0x17   : > { %s3870_s8 = sld [smem:[#allocation12_spill]]  ;;  %p2762_p4 = scmp.ne.s32.totalorder %s3352_s24, 0 }
  0x18   : > { %s3358_s19 = scalar_select %p745_p3, %s3352_s24, 1 }
  0x19   : > { %793 = sbr.rel (%p2762_p4) target bundleno = 269 (0x10d), region = 104  ;;  %v3215_v2 = vmov (!%p2762_p4), 0.0   ;;  %s3873_s20 = sld [smem:[#allocation10_spill]] (!%p2762_p4)  ;;  %vm3216_vm0 = vmmov (!%p2762_p4), 0   ;;  %vm916_vm1 = vcmask (!%p2762_p4), 392192   ;;  %vm834_vm2 = vcmask (!%p2762_p4), 523264  }
  0x1a   : > { %s2822_s2 = sshll.u32 %s3358_s19, 4  ;;  %s782_s18 = scalar_lea.vmem %s3849_s15, %s3358_s19  ;;  %2887 = vmatprep.subr.bf16.mxu0 (!%p2762_p4), %v3215_v2  ;;  %2899 = vmatprep.subr.bf16.mxu1 (!%p2762_p4), %v3215_v2  ;;  %v2769_v11 = vld [vmem:[%s3839_s5] ss:$0 sm:$0xff] (!%p2762_p4)  ;;  %vm967_vm3 = vcmask (!%p2762_p4), 1042432   ;;  %vm975_vm4 = vcmask (!%p2762_p4), 259072   ;;  %vm970_vm5 = vcmask (!%p2762_p4), 1045504  }
  0x1b   : > { %s3399_s1 = scalar_lea.vmem %s3848_s14, %s2822_s2  ;;  %s785_s26 = scalar_lea.vmem %s3850_s16, %s3358_s19  ;;  %2905 = vmatprep.mubr.msk.bf16.mxu1 (!%p2762_p4), %vm3216_vm0, %v3215_v2  ;;  %2895 = vmatprep.mubr.msk.bf16.mxu0 (!%p2762_p4), %vm3216_vm0, %v3215_v2  ;;  %vm972_vm6 = vcmask (!%p2762_p4), 261120  }
  0x1c   : > { %s3368_s4 = scalar_lea.vmem %s3869_s6, %s2822_s2  ;;  %s3390_s6 = scalar_lea.vmem %s3846_s12, %s2822_s2 }
  0x1d   : > { %s3373_s0 = scalar_lea.vmem %s3870_s8, %s2822_s2  ;;  %s774_s8 = scalar_lea.vmem %s3847_s13, %s3358_s19 }
  0x1e   : > { %3871 = sst [smem:[#allocation5_spill]] %s3373_s0  ;;  %s3872_s0 = sld [smem:[#allocation8_spill]] (!%p2762_p4) }
  0x1f   : > { %v3082_v3 = vld [vmem:[%s3873_s20] sm:$0xff] (!%p2762_p4)   ;;  %v3084_v5 = vld [vmem:[%s3873_s20 + $0x8] sm:$0xff] (!%p2762_p4)   ;;  %v3086_v7 = vld [vmem:[%s3873_s20 + $0x10] sm:$0xff] (!%p2762_p4)   ;;  %s3874_s25 = sld [smem:[#allocation7_spill]] (!%p2762_p4)  ;;  %s3875_s22 = sld [smem:[#allocation6_spill]] (!%p2762_p4) }
  0x20   : > { %2900 = vmatpush3.bf16.msra.mxu1 %v3082_v3 }
  0x21   : > { %2901 = vmatprep.subr.bf16.mxu1 %v3215_v2 }
  0x24   : > { %v3081_v1 = vld [vmem:[%s3872_s0] sm:$0xff]   ;;  %v3083_v4 = vld [vmem:[%s3872_s0 + $0x8] sm:$0xff]   ;;  %v3085_v6 = vld [vmem:[%s3872_s0 + $0x10] sm:$0xff]   ;;  %2902 = vmatpush3.bf16.msra.mxu1 %v3084_v5 }
  0x25   : > { %2888 = vmatpush3.bf16.msra.mxu0 %v3081_v1  ;;  %2903 = vmatprep.subr.bf16.mxu1 %v3215_v2  ;;  %v3087_v8 = vld [vmem:[%s3874_s25] sm:$0xff]   ;;  %v3088_v9 = vld [vmem:[%s3872_s0 + $0x18] sm:$0xff]   ;;  %s3876_s25 = sld [smem:[#allocation9_spill]] }
  0x26   : > { %2889 = vmatprep.subr.bf16.mxu0 %v3215_v2  ;;  %v794_v10 = vld [vmem:[%s3875_s22] sm:$0x7] }
  0x28   : > { %2904 = vmatpush3.bf16.msra.mxu1 %v3086_v7 }
  0x29   : > { %2890 = vmatpush3.bf16.msra.mxu0 %v3083_v4 }
  0x2a   : > { %2891 = vmatprep.subr.bf16.mxu0 %v3215_v2 }
  0x2b   : > { %2906 = vmatmul.mubr.msk.bf16.vlgmr.msra.gmra.mrb[0].mxu1 %vm916_vm1, %v3087_v8  ;;  %v2763_v15 = vld [vmem:[%s3876_s25] ss:$0 sm:$0xff] }
  0x2d   : > { %2892 = vmatpush3.bf16.msra.mxu0 %v3085_v6 }
  0x2e   : > { %2893 = vmatprep.subr.bf16.mxu0 %v3215_v2 }
  0x31   : > { %2894 = vmatpush3.bf16.msra.mxu0 %v3088_v9 }
  0x34   : > { %2896 = vmatmul.mubr.msk.bf16.vlgmr.msra.gmra.mrb[0].mxu0 %vm834_vm2, %v794_v10 }
  0xfe   : > { %v954_v12 = vpop.f32.mrb[0].mxu1 }
  0xff   : > { %v955_v13 = vadd.f32 %v2769_v11, %v954_v12  ;;  %v2907_v14 = vpop.f32.mrb[1].mxu1 }
 0x100   : > { %v957_v16 = vpop.f32.mrb[2].mxu1 }
 0x101   : > { %v962_v17 = vrot.slane %v955_v13, 5  ;;  %v958_v18 = vadd.f32 %v2769_v11, %v957_v16  ;;  %v2908_v19 = vpop.f32.mrb[3].mxu1 }
 0x103   : > { %v965_v23 = vrot.slane %v958_v18, 2 }
 0x105   : > { %976 = vst.msk [vmem:[#allocation2 + $0x10] sm:$0x3f] %vm975_vm4, %v965_v23 }
 0x107   : > { %v872_v20 = vpop.f32.mrb[0].mxu0 }
 0x108   : > { %v873_v21 = vadd.f32 %v2763_v15, %v872_v20  ;;  %v2897_v22 = vpop.f32.mrb[1].mxu0 }
 0x109   : > { %v875_v24 = vpop.f32.mrb[2].mxu0 }
 0x10a   : > { %v968_v25 = vsel %vm967_vm3, %v873_v21, %v962_v17  ;;  %v969_v26 = vsel %vm967_vm3, %v962_v17, %v873_v21  ;;  %v2898_v27 = vpop.f32.mrb[3].mxu0 }
 0x10b   : > { %v971_v28 = vsel %vm970_vm5, %v969_v26, %v965_v23  ;;  %973 = vst.msk [vmem:[#allocation2] sm:$0xff] %vm972_vm6, %v968_v25 }
 0x10c   : > { %974 = vst.msk [vmem:[#allocation2 + $0x8] sm:$0xff] %vm972_vm6, %v971_v28 }
 0x10d PF: > { %v3119_v29 = vld [vmem:[%s3368_s4] sm:$0xff]   ;;  %v3120_v30 = vld [vmem:[%s3368_s4 + $0x8] sm:$0xff]   ;;  %vm1005_vm7 = vcmask 261120   ;;  %v979_v33 = vld [vmem:[#allocation2 + $0x10] sm:$0x3f]  ;;  %v3217_v36 = vmov 0.0   ;;  %s3877_s3 = scalar_lea.vmem %s3841_s7, %s3358_s19 }
 0x10e   : > { %2909 = vmatprep.subr.bf16.mxu0 %v3119_v29  ;;  %v981_v35 = vpack.c.bf16 %v979_v33, %v979_v33  ;;  %2917 = vmatprep.subr.bf16.mxu1 %v3217_v36  ;;  %vm3218_vm8 = vmmov 0   ;;  %v2775_v38 = vld [vmem:[%s3877_s3] ss:$0 sm:$0xff]  ;;  %s3219_s27 = smov 120   ;;  %s3220_s28 = smov 96   ;;  %vm1064_vm9 = vcmask 64512  }
 0x10f   : > { %2910 = vmatpush3.bf16.msra.mxu0 %v3119_v29  ;;  %2919 = vmatprep.mubr.msk.bf16.mxu1 %vm3218_vm8, %v3217_v36  ;;  %s3221_s29 = smov 80   ;;  %s3222_s30 = smov 88   ;;  %vm1144_vm10 = vcmask 1044480   ;;  %vm1145_vm11 = vcmask 1045504   ;;  %v3227_v63 = vmov 65535   ;;  %vm1114_vm12 = vcmask 89088  }
 0x110   : > { %2911 = vmatprep.subr.bf16.mxu0 %v3120_v30  ;;  %s3223_s2 = smov 72   ;;  %s3224_s21 = smov 112   ;;  %v1146_v0 = vsel %vm1144_vm10, 4294967295, %v3227_v63  ;;  %vm1118_vm13 = vcmask 83968   ;;  %vm1593_vm14 = vcmask 130048   ;;  %vm1596_vm15 = vcmask 195584  }
 0x111   : > { %s3225_s23 = smov 104   ;;  %s3226_s25 = smov 64   ;;  %v3497_v4 = vsel %vm1145_vm11, %v1146_v0, 0  ;;  %vm2138_vm0 = vcmask 1042432   ;;  %vm2235_vm1 = vcmask 259072  }
 0x112   : > { %v977_v31 = vld [vmem:[#allocation2] sm:$0xff]  ;;  %s3228_s4 = smov 48   ;;  %s3229_s22 = smov 56  }
 0x113   : > { %v978_v32 = vld [vmem:[#allocation2 + $0x8] sm:$0xff]  ;;  %2912 = vmatpush3.bf16.msra.mxu0 %v3120_v30  ;;  %s3230_s3 = smov 40   ;;  %p2815_p5 = scmp.ne.s32.totalorder %s3352_s24, 1 }
 0x114   : > { %v980_v34 = vpack.c.bf16 %v978_v32, %v977_v31  ;;  %2923 = vmatprep.subr.bf16.mxu0 %v3217_v36  ;;  %vm3048_vm2 = vmpackc.low (!%p2815_p5), %vm1005_vm7, %vm1005_vm7  ;;  %vm3235_vm3 = vmmov (!%p2815_p5), 0   ;;  %vm2611_vm4 = vcmask (!%p2815_p5), 179200  }
 0x116   : > { %2913 = vmatprep.mubr.msk.bf16.mxu0 %vm1005_vm7, %v980_v34 }
 0x117   : > { %2914 = vmatmul.mubr.msk.bf16.vlgmr.msra.gmra.mrb[0].mxu0 %vm1005_vm7, %v981_v35 }
 0x118   : > { %2925 = vmatprep.mubr.msk.bf16.mxu0 %vm3218_vm8, %v3217_v36 }
 0x1ea   : > { %v2915_v37 = vpop.f32.mrb[0].mxu0 }
 0x1eb   : > { %v1046_v39 = vpop.f32.mrb[1].mxu0  ;;  %v1055_v42 = vadd.f32 %v2915_v37, %v2775_v38 }
 0x1ec   : > { %v2916_v40 = vpop.f32.mrb[2].mxu0  ;;  %v1047_v43 = vadd.f32 %v2775_v38, %v1046_v39 }
 0x1ed   : > { %v1049_v41 = vpop.f32.mrb[3].mxu0 }
 0x1ee   : > { %v1050_v44 = vadd.f32 %v2775_v38, %v1049_v41 }
 0x1f0   : > { %v3462_v45 = vpack.c.bf16 %v1050_v44, %v1047_v43  ;;  %v1599_v46 = vpack.c.bf16 %v1055_v42, %v1050_v44 }
 0x1f2   : > { %1192 = vrot.lane.b32.xlu1 %v3462_v45, %s3219_s27  ;;  %1062 = vrot.lane.b32.xlu0 %v3462_v45, %s3220_s28  ;;  %v1601_v47 = vshrl.u32 %v1599_v46, 16  ;;  %v1604_v48 = vshll.u32 %v1599_v46, 16 }
 0x1f4   : > { %v1603_v49 = vrot.slane %v1601_v47, 1  ;;  %v1606_v50 = vrot.slane %v1604_v48, 2 }
 0x1f6   : > { %1319 = vrot.lane.b32.xlu1 %v3462_v45, %s3221_s29  ;;  %1194 = vrot.lane.b32.xlu0 %v3462_v45, %s3222_s30  ;;  %v3470_v51 = vor.u32 %v1606_v50, %v1603_v49 }
 0x1fa   : > { %1444 = vrot.lane.b32.xlu1 %v3462_v45, %s3223_s2  ;;  %1317 = vrot.lane.b32.xlu0 %v3462_v45, %s3224_s21 }
 0x1fe   : > { %1608 = vrot.lane.b32.xlu1 %v3470_v51, %s3220_s28  ;;  %1442 = vrot.lane.b32.xlu0 %v3462_v45, %s3225_s23  ;;  %s3232_s28 = smov 16  }
 0x202   : > { %1731 = vrot.lane.b32.xlu1 %v3470_v51, %s3219_s27  ;;  %1733 = vrot.lane.b32.xlu0 %v3470_v51, %s3222_s30  ;;  %s3231_s27 = smov 8   ;;  %s3233_s30 = smov 24  }
 0x206   : > { %1856 = vrot.lane.b32.xlu1 %v3470_v51, %s3224_s21  ;;  %1858 = vrot.lane.b32.xlu0 %v3470_v51, %s3221_s29  ;;  %s3878_s29 = sld [smem:[#allocation5_spill]] }
 0x20a   : > { %1981 = vrot.lane.b32.xlu1 %v3470_v51, %s3225_s23  ;;  %1983 = vrot.lane.b32.xlu0 %v3470_v51, %s3223_s2  ;;  %s3879_s23 = scalar_lea.vmem %s3843_s9, %s3358_s19 }
 0x20e   : > { %1139 = vrot.lane.b32.xlu1 %v3462_v45, %s3226_s25 }
 0x264   : > { %v1193_v52 = vpop.permute.xlu1 %1192  ;;  %v1063_v53 = vpop.permute.xlu0 %1062 }
 0x265   : > { %v1069_v54 = vsel %vm1064_vm9, %v1063_v53, 0 }
 0x266   : > { %2918 = vmatpush3.bf16.xpose.msra.mxu1 %v1069_v54 }
 0x267   : > { %2929 = vmatprep.subr.bf16.mxu1 %v3217_v36 }
 0x268   : > { %v1320_v55 = vpop.permute.xlu1 %1319  ;;  %v1195_v56 = vpop.permute.xlu0 %1194 }
 0x269   : > { %v1200_v58 = vsel %vm1064_vm9, %v1195_v56, 0  ;;  %v1325_v61 = vsel %vm1064_vm9, %v1320_v55, 0 }
 0x26c   : > { %v1445_v57 = vpop.permute.xlu1 %1444  ;;  %v1318_v1 = vpop.permute.xlu0 %1317 }
 0x26d   : > { %2920 = vmatmul.mubr.msk.bf16.vlgmr.msra.gmra.mrb[0].mxu1 %vm1064_vm9, %v3462_v45  ;;  %v1450_v3 = vsel %vm1064_vm9, %v1445_v57, 0 }
 0x26e   : > { %2930 = vmatpush3.bf16.xpose.msra.mxu1 %v1200_v58  ;;  %2931 = vmatprep.mubr.msk.bf16.mxu1 %vm3218_vm8, %v3217_v36 }
 0x26f   : > { %2941 = vmatprep.subr.bf16.mxu1 %v3217_v36 }
 0x270   : > { %v1609_v59 = vpop.permute.xlu1 %1608  ;;  %v1443_v7 = vpop.permute.xlu0 %1442 }
 0x271   : > { %v1614_v8 = vsel %vm1064_vm9, %v1609_v59, 0 }
 0x274   : > { %v1732_v60 = vpop.permute.xlu1 %1731  ;;  %v1734_v9 = vpop.permute.xlu0 %1733 }
 0x275   : > { %2932 = vmatmul.mubr.msk.bf16.vlgmr.msra.gmra.mrb[4].mxu1 %vm1064_vm9, %v1193_v52  ;;  %v1739_v10 = vsel %vm1064_vm9, %v1734_v9, 0 }
 0x276   : > { %2942 = vmatpush3.bf16.xpose.msra.mxu1 %v1325_v61  ;;  %2943 = vmatprep.mubr.msk.bf16.mxu1 %vm3218_vm8, %v3217_v36 }
 0x277   : > { %2953 = vmatprep.subr.bf16.mxu1 %v3217_v36 }
 0x278   : > { %v1857_v62 = vpop.permute.xlu1 %1856  ;;  %v1859_v11 = vpop.permute.xlu0 %1858 }
 0x279   : > { %v1864_v12 = vsel %vm1064_vm9, %v1859_v11, 0 }
 0x27c   : > { %v1982_v2 = vpop.permute.xlu1 %1981  ;;  %v1984_v13 = vpop.permute.xlu0 %1983 }
 0x27d   : > { %2944 = vmatmul.mubr.msk.bf16.vlgmr.msra.gmra.mrb[8].mxu1 %vm1064_vm9, %v1318_v1  ;;  %v1989_v14 = vsel %vm1064_vm9, %v1984_v13, 0 }
 0x27e   : > { %2954 = vmatpush3.bf16.xpose.msra.mxu1 %v1450_v3  ;;  %2955 = vmatprep.mubr.msk.bf16.mxu1 %vm3218_vm8, %v3217_v36 }
 0x27f   : > { %2965 = vmatprep.subr.bf16.mxu1 %v3217_v36 }
 0x280   : > { %v1140_v5 = vpop.permute.xlu1 %1139 }
 0x281   : > { %v1149_v6 = vand.u32 %v3497_v4, %v1140_v5 }
 0x283   : > { %2924 = vmatpush3.bf16.msra.mxu0 %v1149_v6 }
 0x284   : > { %2935 = vmatprep.subr.bf16.mxu0 %v3217_v36 }
 0x285   : > { %2956 = vmatmul.mubr.msk.bf16.vlgmr.msra.gmra.mrb[12].mxu1 %vm1064_vm9, %v1443_v7 }
 0x286   : > { %2966 = vmatpush3.bf16.xpose.msra.mxu1 %v1614_v8  ;;  %2967 = vmatprep.mubr.msk.bf16.mxu1 %vm3218_vm8, %v3217_v36 }
 0x287   : > { %2977 = vmatprep.subr.bf16.mxu1 %v3217_v36 }
 0x28d   : > { %2968 = vmatmul.mubr.msk.bf16.vlgmr.msra.gmra.mrb[16].mxu1 %vm1064_vm9, %v3470_v51 }
 0x28e   : > { %2978 = vmatpush3.bf16.xpose.msra.mxu1 %v1739_v10  ;;  %2979 = vmatprep.mubr.msk.bf16.mxu1 %vm3218_vm8, %v3217_v36 }
 0x28f   : > { %2989 = vmatprep.subr.bf16.mxu1 %v3217_v36 }
 0x295   : > { %2980 = vmatmul.mubr.msk.bf16.vlgmr.msra.gmra.mrb[20].mxu1 %vm1064_vm9, %v1732_v60 }
 0x296   : > { %2990 = vmatpush3.bf16.xpose.msra.mxu1 %v1864_v12  ;;  %2991 = vmatprep.mubr.msk.bf16.mxu1 %vm3218_vm8, %v3217_v36 }
 0x297   : > { %3001 = vmatprep.subr.bf16.mxu1 %v3217_v36 }
 0x29d   : > { %2992 = vmatmul.mubr.msk.bf16.vlgmr.msra.gmra.mrb[24].mxu1 %vm1064_vm9, %v1857_v62 }
 0x29e   : > { %3002 = vmatpush3.bf16.xpose.msra.mxu1 %v1989_v14  ;;  %3003 = vmatprep.mubr.msk.bf16.mxu1 %vm3218_vm8, %v3217_v36 }
 0x2a5   : > { %3004 = vmatmul.mubr.msk.bf16.vlgmr.msra.gmra.mrb[28].mxu1 %vm1064_vm9, %v1982_v2 }
 0x340   : > { %v1105_v15 = vpop.f32.mrb[0].mxu1 }
 0x341   : > { %v3525_v16 = vmul.f32 0.35355338, %v1105_v15  ;;  %v2921_v17 = vpop.f32.mrb[1].mxu1 }
 0x342   : > { %v1108_v18 = vpop.f32.mrb[2].mxu1 }
 0x343   : > { %v3527_v19 = vmul.f32 0.35355338, %v1108_v18  ;;  %v2922_v20 = vpop.f32.mrb[3].mxu1  ;;  %v1115_v21 = vsel %vm1114_vm12, %v3525_v16, -inf }
 0x344   : > { %1116 = vmax.xlane.f32.xlu0 %v1115_v21 }
 0x345   : > { %v1119_v22 = vsel %vm1118_vm13, %v3527_v19, -inf }
 0x346   : > { %1120 = vmax.xlane.f32.xlu1 %v1119_v22 }
 0x348   : > { %v1236_v23 = vpop.f32.mrb[4].mxu1 }
 0x349   : > { %v3533_v24 = vmul.f32 0.35355338, %v1236_v23  ;;  %v2933_v25 = vpop.f32.mrb[5].mxu1 }
 0x34a   : > { %v1239_v26 = vpop.f32.mrb[6].mxu1 }
 0x34b   : > { %v3535_v27 = vmul.f32 0.35355338, %v1239_v26  ;;  %v2934_v28 = vpop.f32.mrb[7].mxu1  ;;  %v1245_v29 = vsel %vm1114_vm12, %v3533_v24, -inf }
 0x34c   : > { %1246 = vmax.xlane.f32.xlu0 %v1245_v29 }
 0x34d   : > { %v1248_v30 = vsel %vm1118_vm13, %v3535_v27, -inf }
 0x350   : > { %1249 = vmax.xlane.f32.xlu0 %v1248_v30  ;;  %v1361_v31 = vpop.f32.mrb[8].mxu1 }
 0x351   : > { %v3541_v32 = vmul.f32 0.35355338, %v1361_v31  ;;  %v2945_v33 = vpop.f32.mrb[9].mxu1 }
 0x352   : > { %v1364_v34 = vpop.f32.mrb[10].mxu1 }
 0x353   : > { %v3543_v35 = vmul.f32 0.35355338, %v1364_v34  ;;  %v2946_v37 = vpop.f32.mrb[11].mxu1  ;;  %v1370_v38 = vsel %vm1114_vm12, %v3541_v32, -inf }
 0x354   : > { %1371 = vmax.xlane.f32.xlu1 %v1370_v38 }
 0x355   : > { %v1373_v39 = vsel %vm1118_vm13, %v3543_v35, -inf }
 0x356   : > { %1374 = vmax.xlane.f32.xlu0 %v1373_v39 }
 0x358   : > { %v1486_v40 = vpop.f32.mrb[12].mxu1 }
 0x359   : > { %v2957_v41 = vpop.f32.mrb[13].mxu1  ;;  %v3553_v62 = vmul.f32 0.35355338, %v1486_v40 }
 0x35a   : > { %v1489_v42 = vpop.f32.mrb[14].mxu1 }
 0x35b   : > { %v2958_v43 = vpop.f32.mrb[15].mxu1  ;;  %v3555_v63 = vmul.f32 0.35355338, %v1489_v42  ;;  %v1495_v1 = vsel %vm1114_vm12, %v3553_v62, -inf }
 0x35d   : > { %v1498_v3 = vsel %vm1118_vm13, %v3555_v63, -inf }
 0x360   : > { %v1650_v44 = vpop.f32.mrb[16].mxu1 }
 0x361   : > { %v2969_v46 = vpop.f32.mrb[17].mxu1  ;;  %v3557_v0 = vmul.f32 0.35355338, %v1650_v44 }
 0x362   : > { %v1653_v47 = vpop.f32.mrb[18].mxu1 }
 0x363   : > { %v2970_v48 = vpop.f32.mrb[19].mxu1  ;;  %v3561_v2 = vmul.f32 0.35355338, %v1653_v47  ;;  %v1659_v6 = vsel %vm1114_vm12, %v3557_v0, -inf }
 0x365   : > { %1393 = vrot.lane.b32.xlu1 %v3462_v45, %s3228_s4  ;;  %v1662_v8 = vsel %vm1118_vm13, %v3561_v2, -inf }
 0x368   : > { %v1775_v49 = vpop.f32.mrb[20].mxu1 }
 0x369   : > { %v2981_v50 = vpop.f32.mrb[21].mxu1  ;;  %v3565_v5 = vmul.f32 0.35355338, %v1775_v49 }
 0x36a   : > { %v1778_v52 = vpop.f32.mrb[22].mxu1 }
 0x36b   : > { %v2982_v53 = vpop.f32.mrb[23].mxu1  ;;  %v3569_v7 = vmul.f32 0.35355338, %v1778_v52  ;;  %v1784_v10 = vsel %vm1114_vm12, %v3565_v5, -inf }
 0x36c   : > { %1268 = vrot.lane.b32.xlu0 %v3462_v45, %s3229_s22 }
 0x36d   : > { %v1787_v12 = vsel %vm1118_vm13, %v3569_v7, -inf }
 0x370   : > { %v1900_v54 = vpop.f32.mrb[24].mxu1 }
 0x371   : > { %v2993_v55 = vpop.f32.mrb[25].mxu1  ;;  %v3573_v9 = vmul.f32 0.35355338, %v1900_v54 }
 0x372   : > { %v1903_v56 = vpop.f32.mrb[26].mxu1 }
 0x373   : > { %v2994_v57 = vpop.f32.mrb[27].mxu1  ;;  %v3577_v11 = vmul.f32 0.35355338, %v1903_v56  ;;  %v1909_v14 = vsel %vm1114_vm12, %v3573_v9, -inf }
 0x375   : > { %v1912_v17 = vsel %vm1118_vm13, %v3577_v11, -inf }
 0x378   : > { %v2025_v58 = vpop.f32.mrb[28].mxu1 }
 0x379   : > { %v3005_v59 = vpop.f32.mrb[29].mxu1  ;;  %v3581_v13 = vmul.f32 0.35355338, %v2025_v58 }
 0x37a   : > { %v2028_v60 = vpop.f32.mrb[30].mxu1 }
 0x37b   : > { %v3006_v61 = vpop.f32.mrb[31].mxu1  ;;  %v3585_v15 = vmul.f32 0.35355338, %v2028_v60  ;;  %v2034_v18 = vsel %vm1114_vm12, %v3581_v13, -inf }
 0x37d   : > { %v2037_v20 = vsel %vm1118_vm13, %v3585_v15, -inf }
 0x389   : > { %1496 = vmax.xlane.f32.xlu1 %v1495_v1 }
 0x38b   : > { %1499 = vmax.xlane.f32.xlu0 %v1498_v3 }
 0x38d   : > { %1660 = vmax.xlane.f32.xlu1 %v1659_v6 }
 0x38f   : > { %1663 = vmax.xlane.f32.xlu0 %v1662_v8 }
 0x391   : > { %1785 = vmax.xlane.f32.xlu1 %v1784_v10 }
 0x393   : > { %1788 = vmax.xlane.f32.xlu0 %v1787_v12 }
 0x395   : > { %1910 = vmax.xlane.f32.xlu1 %v1909_v14 }
 0x397   : > { %1913 = vmax.xlane.f32.xlu0 %v1912_v17 }
 0x399   : > { %2035 = vmax.xlane.f32.xlu1 %v2034_v18 }
 0x39b   : > { %2038 = vmax.xlane.f32.xlu0 %v2037_v20 }
 0x3aa   : > { %1518 = vrot.lane.b32.xlu1 %v3462_v45, %s3230_s3 }
 0x3d1   : > { %v1117_v21 = vpop.xlane.xlu0 %1116 }
 0x3d2   : > { %v1122_v22 = vsub.f32 %v3525_v16, %v1117_v21 }
 0x3d3   : > { %v1121_v23 = vpop.xlane.xlu1 %1120 }
 0x3d4   : > { %v1124_v25 = vmul.f32 1.442695, %v1122_v22  ;;  %v1123_v26 = vsub.f32 %v3527_v19, %v1121_v23 }
 0x3d6   : > { %3127 = vpow2.f32 %v1124_v25  ;;  %v1126_v28 = vmul.f32 1.442695, %v1123_v26 }
 0x3d8   : > { %3129 = vpow2.f32 %v1126_v28 }
 0x3d9   : > { %v1247_v29 = vpop.xlane.xlu0 %1246 }
 0x3da   : > { %v1251_v30 = vsub.f32 %v3533_v24, %v1247_v29 }
 0x3dc   : > { %v1253_v31 = vmul.f32 1.442695, %v1251_v30 }
 0x3dd   : > { %v1250_v33 = vpop.xlane.xlu0 %1249 }
 0x3de   : > { %3131 = vpow2.f32 %v1253_v31  ;;  %v1252_v34 = vsub.f32 %v3535_v27, %v1250_v33 }
 0x3e0   : > { %v3599_v37 = vpop.eup %3127  ;;  %v1255_v45 = vmul.f32 1.442695, %v1252_v34 }
 0x3e1   : > { %v1372_v38 = vpop.xlane.xlu1 %1371  ;;  %v1128_v16 = vsel %vm1114_vm12, %v3599_v37, 0.0 }
 0x3e2   : > { %v3603_v39 = vpop.eup %3129  ;;  %3133 = vpow2.f32 %v1255_v45  ;;  %v1376_v19 = vsub.f32 %v3541_v32, %v1372_v38  ;;  %1129 = vadd.xlane.f32.xlu1 %v1128_v16 }
 0x3e3   : > { %v1131_v24 = vsel %vm1118_vm13, %v3603_v39, 0.0  ;;  %v1375_v46 = vpop.xlane.xlu0 %1374 }
 0x3e4   : > { %v1378_v40 = vmul.f32 1.442695, %v1376_v19  ;;  %1132 = vadd.xlane.f32.xlu0 %v1131_v24  ;;  %v1377_v47 = vsub.f32 %v3543_v35, %v1375_v46 }
 0x3e5   : > { %v3623_v49 = vpop.permute.xlu1 %1393 }
 0x3e6   : > { %3135 = vpow2.f32 %v1378_v40  ;;  %v1380_v48 = vmul.f32 1.442695, %v1377_v47 }
 0x3e7   : > { %v3625_v50 = vpop.permute.xlu0 %1268 }
 0x3e8   : > { %v3608_v27 = vpop.eup %3131  ;;  %3137 = vpow2.f32 %v1380_v48 }
 0x3e9   : > { %v1257_v41 = vsel %vm1114_vm12, %v3608_v27, 0.0 }
 0x3ea   : > { %1258 = vadd.xlane.f32.xlu1 %v1257_v41 }
 0x3ec   : > { %v3612_v42 = vpop.eup %3133 }
 0x3ed   : > { %v1260_v43 = vsel %vm1118_vm13, %v3612_v42, 0.0 }
 0x3ee   : > { %1261 = vadd.xlane.f32.xlu0 %v1260_v43 }
 0x3f0   : > { %v3616_v32 = vpop.eup %3135 }
 0x3f1   : > { %v1382_v44 = vsel %vm1114_vm12, %v3616_v32, 0.0 }
 0x3f2   : > { %1383 = vadd.xlane.f32.xlu1 %v1382_v44  ;;  %v3631_v3 = vpop.eup %3137 }
 0x404   : > { %1682 = vrot.lane.b32.xlu0 %v3470_v51, %s3226_s25 }
 0x416   : > { %v1497_v52 = vpop.xlane.xlu1 %1496 }
 0x417   : > { %v1501_v53 = vsub.f32 %v3553_v62, %v1497_v52 }
 0x418   : > { %v1500_v54 = vpop.xlane.xlu0 %1499 }
 0x419   : > { %v1503_v55 = vmul.f32 1.442695, %v1501_v53  ;;  %v1502_v56 = vsub.f32 %v3555_v63, %v1500_v54 }
 0x41a   : > { %v1661_v57 = vpop.xlane.xlu1 %1660 }
 0x41b   : > { %3139 = vpow2.f32 %v1503_v55  ;;  %v1505_v58 = vmul.f32 1.442695, %v1502_v56  ;;  %v1665_v59 = vsub.f32 %v3557_v0, %v1661_v57  ;;  %v1385_v0 = vsel %vm1118_vm13, %v3631_v3, 0.0 }
 0x41c   : > { %v1664_v60 = vpop.xlane.xlu0 %1663 }
 0x41d   : > { %3141 = vpow2.f32 %v1505_v58  ;;  %v1667_v35 = vmul.f32 1.442695, %v1665_v59  ;;  %v1666_v61 = vsub.f32 %v3561_v2, %v1664_v60  ;;  %v1274_v60 = vand.u32 %v3625_v50, %v3497_v4 }
 0x41e   : > { %v1786_v1 = vpop.xlane.xlu1 %1785 }
 0x41f   : > { %3143 = vpow2.f32 %v1667_v35  ;;  %v1669_v6 = vmul.f32 1.442695, %v1666_v61  ;;  %v1790_v62 = vsub.f32 %v3565_v5, %v1786_v1 }
 0x420   : > { %v1789_v8 = vpop.xlane.xlu0 %1788 }
 0x421   : > { %3145 = vpow2.f32 %v1669_v6  ;;  %v1792_v63 = vmul.f32 1.442695, %v1790_v62  ;;  %v1791_v10 = vsub.f32 %v3569_v7, %v1789_v8 }
 0x422   : > { %v1911_v12 = vpop.xlane.xlu1 %1910 }
 0x423   : > { %1386 = vadd.xlane.f32.xlu0 %v1385_v0  ;;  %3147 = vpow2.f32 %v1792_v63  ;;  %v1794_v2 = vmul.f32 1.442695, %v1791_v10  ;;  %v1915_v17 = vsub.f32 %v3573_v9, %v1911_v12 }
 0x424   : > { %v1914_v16 = vpop.xlane.xlu0 %1913 }
 0x425   : > { %v3637_v14 = vpop.eup %3139  ;;  %3149 = vpow2.f32 %v1794_v2  ;;  %v1917_v7 = vmul.f32 1.442695, %v1915_v17  ;;  %v1916_v19 = vsub.f32 %v3577_v11, %v1914_v16 }
 0x426   : > { %v2036_v18 = vpop.xlane.xlu1 %2035  ;;  %v1507_v5 = vsel %vm1114_vm12, %v3637_v14, 0.0 }
 0x427   : > { %v3642_v20 = vpop.eup %3141  ;;  %1508 = vadd.xlane.f32.xlu0 %v1507_v5  ;;  %v2040_v22 = vsub.f32 %v3581_v13, %v2036_v18  ;;  %3151 = vpow2.f32 %v1917_v7  ;;  %v1919_v40 = vmul.f32 1.442695, %v1916_v19 }
 0x428   : > { %v1510_v25 = vsel %vm1118_vm13, %v3642_v20, 0.0  ;;  %v2039_v24 = vpop.xlane.xlu0 %2038 }
 0x429   : > { %v3644_v21 = vpop.eup %3143  ;;  %v2042_v26 = vmul.f32 1.442695, %v2040_v22  ;;  %v2041_v41 = vsub.f32 %v3585_v15, %v2039_v24 }
 0x42a   : > { %v1671_v23 = vsel %vm1114_vm12, %v3644_v21, 0.0  ;;  %v1519_v48 = vpop.permute.xlu1 %1518 }
 0x42b   : > { %v3651_v9 = vpop.eup %3145  ;;  %1672 = vadd.xlane.f32.xlu1 %v1671_v23  ;;  %1511 = vadd.xlane.f32.xlu0 %v1510_v25  ;;  %3153 = vpow2.f32 %v2042_v26  ;;  %v2044_v43 = vmul.f32 1.442695, %v2041_v41  ;;  %v1524_v17 = vand.u32 %v1519_v48, %v3497_v4 }
 0x42c   : > { %v1674_v28 = vsel %vm1118_vm13, %v3651_v9, 0.0  ;;  %3155 = vpow2.f32 %v1919_v40 }
 0x42d   : > { %v3655_v29 = vpop.eup %3147  ;;  %3157 = vpow2.f32 %v2044_v43 }
 0x42e   : > { %v1796_v13 = vsel %vm1114_vm12, %v3655_v29, 0.0 }
 0x42f   : > { %1675 = vadd.xlane.f32.xlu0 %v1674_v28  ;;  %v3659_v30 = vpop.eup %3149 }
 0x430   : > { %v1799_v31 = vsel %vm1118_vm13, %v3659_v30, 0.0 }
 0x431   : > { %v3663_v33 = vpop.eup %3151 }
 0x432   : > { %v1921_v34 = vsel %vm1114_vm12, %v3663_v33, 0.0 }
 0x433   : > { %1797 = vadd.xlane.f32.xlu0 %v1796_v13 }
 0x435   : > { %v3667_v45 = vpop.eup %3153 }
 0x436   : > { %v2046_v38 = vsel %vm1114_vm12, %v3667_v45, 0.0  ;;  %v3677_v44 = vpop.eup %3155 }
 0x437   : > { %1800 = vadd.xlane.f32.xlu0 %v1799_v31  ;;  %v1924_v46 = vsel %vm1118_vm13, %v3677_v44, 0.0  ;;  %v3681_v47 = vpop.eup %3157 }
 0x438   : > { %v2049_v11 = vsel %vm1118_vm13, %v3681_v47, 0.0 }
 0x43b   : > { %1922 = vadd.xlane.f32.xlu0 %v1921_v34 }
 0x43c   : > { %1807 = vrot.lane.b32.xlu1 %v3470_v51, %s3229_s22 }
 0x43f   : > { %2047 = vadd.xlane.f32.xlu0 %v2046_v38 }
 0x455   : > { %1932 = vrot.lane.b32.xlu0 %v3470_v51, %s3228_s4  ;;  %s3880_s4 = scalar_lea.vmem %s3844_s10, %s3358_s19 }
 0x460   : > { %1925 = vadd.xlane.f32.xlu1 %v1924_v46 }
 0x464   : > { %2050 = vadd.xlane.f32.xlu1 %v2049_v11 }
 0x46f   : > { %v1130_v15 = vpop.xlane.xlu1 %1129 }
 0x470   : > { %3159 = vrcp.f32 %v1130_v15 }
 0x471   : > { %v1133_v52 = vpop.xlane.xlu0 %1132 }
 0x472   : > { %3161 = vrcp.f32 %v1133_v52 }
 0x475   : > { %2057 = vrot.lane.b32.xlu1 %v3470_v51, %s3230_s3 }
 0x477   : > { %v1259_v53 = vpop.xlane.xlu1 %1258 }
 0x478   : > { %3163 = vrcp.f32 %v1259_v53 }
 0x47a   : > { %v3160_v54 = vpop.eup %3159 }
 0x47b   : > { %v1262_v55 = vpop.xlane.xlu0 %1261  ;;  %v1136_v57 = vmul.f32 %v3160_v54, %v3599_v37 }
 0x47c   : > { %v3162_v56 = vpop.eup %3161  ;;  %3165 = vrcp.f32 %v1262_v55 }
 0x47d   : > { %v1137_v58 = vmul.f32 %v3162_v56, %v3603_v39  ;;  %v1399_v39 = vand.u32 %v3623_v49, %v3497_v4 }
 0x47f   : > { %v1138_v59 = vpack.c.bf16 %v1137_v58, %v1136_v57  ;;  %v1384_v50 = vpop.xlane.xlu1 %1383  ;;  %v1683_v6 = vpop.permute.xlu0 %1682 }
 0x480   : > { %3167 = vrcp.f32 %v1384_v50  ;;  %v1688_v26 = vand.u32 %v1683_v6, %v3497_v4 }
 0x481   : > { %2926 = vmatmul.mubr.msk.bf16.vlgmr.msra.gmra.mrb[4].mxu0 %vm1114_vm12, %v1138_v59 }
 0x482   : > { %2936 = vmatpush3.bf16.msra.mxu0 %v1274_v60  ;;  %2937 = vmatprep.mubr.msk.bf16.mxu0 %vm3218_vm8, %v3217_v36  ;;  %v3164_v51 = vpop.eup %3163 }
 0x483   : > { %2947 = vmatprep.subr.bf16.mxu0 %v3217_v36  ;;  %v1265_v61 = vmul.f32 %v3164_v51, %v3608_v27 }
 0x486   : > { %v3166_v35 = vpop.eup %3165 }
 0x487   : > { %v1266_v37 = vmul.f32 %v3166_v35, %v3612_v42 }
 0x489   : > { %v1267_v1 = vpack.c.bf16 %v1266_v37, %v1265_v61 }
 0x48a   : > { %v3168_v8 = vpop.eup %3167 }
 0x48b   : > { %2938 = vmatmul.mubr.msk.bf16.vlgmr.msra.gmra.mrb[8].mxu0 %vm1114_vm12, %v1267_v1  ;;  %v1390_v49 = vmul.f32 %v3168_v8, %v3616_v32 }
 0x48c   : > { %2948 = vmatpush3.bf16.msra.mxu0 %v1399_v39  ;;  %2949 = vmatprep.mubr.msk.bf16.mxu0 %vm3218_vm8, %v3217_v36 }
 0x48d   : > { %2959 = vmatprep.subr.bf16.mxu0 %v3217_v36 }
 0x4b0   : > { %v1387_v62 = vpop.xlane.xlu0 %1386 }
 0x4b1   : > { %3169 = vrcp.f32 %v1387_v62 }
 0x4b4   : > { %v1509_v27 = vpop.xlane.xlu0 %1508 }
 0x4b5   : > { %3171 = vrcp.f32 %v1509_v27 }
 0x4b8   : > { %v1512_v42 = vpop.xlane.xlu0 %1511  ;;  %v1673_v0 = vpop.xlane.xlu1 %1672 }
 0x4b9   : > { %3173 = vrcp.f32 %v1512_v42 }
 0x4bb   : > { %v3170_v63 = vpop.eup %3169 }
 0x4bc   : > { %v1391_v10 = vmul.f32 %v3170_v63, %v3631_v3  ;;  %v1676_v12 = vpop.xlane.xlu0 %1675 }
 0x4bd   : > { %3175 = vrcp.f32 %v1676_v12 }
 0x4be   : > { %v1392_v2 = vpack.c.bf16 %v1391_v10, %v1390_v49  ;;  %3177 = vrcp.f32 %v1673_v0 }
 0x4bf   : > { %v3172_v5 = vpop.eup %3171 }
 0x4c0   : > { %2950 = vmatmul.mubr.msk.bf16.vlgmr.msra.gmra.mrb[12].mxu0 %vm1114_vm12, %v1392_v2  ;;  %v1798_v18 = vpop.xlane.xlu0 %1797  ;;  %v1515_v3 = vmul.f32 %v3172_v5, %v3637_v14 }
 0x4c1   : > { %2960 = vmatpush3.bf16.msra.mxu0 %v1524_v17  ;;  %2961 = vmatprep.mubr.msk.bf16.mxu0 %vm3218_vm8, %v3217_v36 }
 0x4c2   : > { %2971 = vmatprep.subr.bf16.mxu0 %v3217_v36 }
 0x4c3   : > { %v3174_v32 = vpop.eup %3173 }
 0x4c4   : > { %v1801_v7 = vpop.xlane.xlu0 %1800  ;;  %v1516_v22 = vmul.f32 %v3174_v32, %v3642_v20  ;;  %v1808_v20 = vpop.permute.xlu1 %1807 }
 0x4c5   : > { %3179 = vrcp.f32 %v1801_v7  ;;  %v1813_v19 = vand.u32 %v1808_v20, %v3497_v4 }
 0x4c6   : > { %v1517_v23 = vpack.c.bf16 %v1516_v22, %v1515_v3  ;;  %3181 = vrcp.f32 %v1798_v18 }
 0x4c7   : > { %v3176_v25 = vpop.eup %3175 }
 0x4c8   : > { %2962 = vmatmul.mubr.msk.bf16.vlgmr.msra.gmra.mrb[16].mxu0 %vm1114_vm12, %v1517_v23  ;;  %v1923_v28 = vpop.xlane.xlu0 %1922  ;;  %v3178_v13 = vpop.eup %3177  ;;  %v1680_v31 = vmul.f32 %v3176_v25, %v3651_v9  ;;  %v3121_v25 = vld [vmem:[%s3878_s29] sm:$0xff]  }
 0x4c9   : > { %2972 = vmatpush3.bf16.msra.mxu0 %v1688_v26  ;;  %2973 = vmatprep.mubr.msk.bf16.mxu0 %vm3218_vm8, %v3217_v36  ;;  %v1679_v14 = vmul.f32 %v3178_v13, %v3644_v21  ;;  %3183 = vrcp.f32 %v1923_v28  ;;  %v3122_v26 = vld [vmem:[%s3878_s29 + $0x8] sm:$0xff]  }
 0x4ca   : > { %2983 = vmatprep.subr.bf16.mxu0 %v3217_v36  ;;  %3013 = vmatprep.subr.bf16.mxu1 %v3121_v25 }
 0x4cb   : > { %v1681_v38 = vpack.c.bf16 %v1680_v31, %v1679_v14  ;;  %3014 = vmatpush3.bf16.msra.mxu1 %v3121_v25 }
 0x4cc   : > { %v2048_v34 = vpop.xlane.xlu0 %2047  ;;  %3015 = vmatprep.subr.bf16.mxu1 %v3122_v26 }
 0x4cf   : > { %v3180_v16 = vpop.eup %3179  ;;  %3016 = vmatpush3.bf16.msra.mxu1 %v3122_v26 }
 0x4d0   : > { %2974 = vmatmul.mubr.msk.bf16.vlgmr.msra.gmra.mrb[20].mxu0 %vm1114_vm12, %v1681_v38  ;;  %v3182_v24 = vpop.eup %3181  ;;  %v1805_v40 = vmul.f32 %v3180_v16, %v3659_v30  ;;  %v1933_v21 = vpop.permute.xlu0 %1932 }
 0x4d1   : > { %2984 = vmatpush3.bf16.msra.mxu0 %v1813_v19  ;;  %2985 = vmatprep.mubr.msk.bf16.mxu0 %vm3218_vm8, %v3217_v36  ;;  %v1804_v9 = vmul.f32 %v3182_v24, %v3655_v29  ;;  %v1938_v43 = vand.u32 %v1933_v21, %v3497_v4 }
 0x4d2   : > { %2995 = vmatprep.subr.bf16.mxu0 %v3217_v36 }
 0x4d3   : > { %v1806_v41 = vpack.c.bf16 %v1805_v40, %v1804_v9  ;;  %v3184_v11 = vpop.eup %3183 }
 0x4d4   : > { %v1929_v48 = vmul.f32 %v3184_v11, %v3663_v33 }
 0x4d8   : > { %2986 = vmatmul.mubr.msk.bf16.vlgmr.msra.gmra.mrb[24].mxu0 %vm1114_vm12, %v1806_v41 }
 0x4d9   : > { %2996 = vmatpush3.bf16.msra.mxu0 %v1938_v43  ;;  %2997 = vmatprep.mubr.msk.bf16.mxu0 %vm3218_vm8, %v3217_v36 }
 0x4da   : > { %3007 = vmatprep.subr.bf16.mxu0 %v3217_v36 }
 0x4ed   : > { %v1926_v46 = vpop.xlane.xlu1 %1925 }
 0x4ee   : > { %3185 = vrcp.f32 %v1926_v46 }
 0x4f1   : > { %v2051_v30 = vpop.xlane.xlu1 %2050 }
 0x4f2   : > { %3187 = vrcp.f32 %v2051_v30 }
 0x4f3   : > { %3189 = vrcp.f32 %v2048_v34 }
 0x4f5   : > { %v2058_v52 = vpop.permute.xlu1 %2057 }
 0x4f6   : > { %v2063_v55 = vand.u32 %v2058_v52, %v3497_v4 }
 0x4f8   : > { %v3186_v29 = vpop.eup %3185 }
 0x4f9   : > { %v1930_v15 = vmul.f32 %v3186_v29, %v3677_v44 }
 0x4fb   : > { %v1931_v53 = vpack.c.bf16 %v1930_v15, %v1929_v48 }
 0x4fc   : > { %v3188_v54 = vpop.eup %3187 }
 0x4fd   : > { %2998 = vmatmul.mubr.msk.bf16.vlgmr.msra.gmra.mrb[28].mxu0 %vm1114_vm12, %v1931_v53  ;;  %v3190_v56 = vpop.eup %3189  ;;  %v2055_v57 = vmul.f32 %v3188_v54, %v3681_v47 }
 0x4fe   : > { %3008 = vmatpush3.bf16.msra.mxu0 %v2063_v55  ;;  %3009 = vmatprep.mubr.msk.bf16.mxu0 %vm3218_vm8, %v3217_v36  ;;  %v2054_v58 = vmul.f32 %v3190_v56, %v3667_v45 }
 0x500   : > { %v2056_v59 = vpack.c.bf16 %v2055_v57, %v2054_v58 }
 0x505   : > { %3010 = vmatmul.mubr.msk.bf16.vlgmr.msra.gmra.mrb[32].mxu0 %vm1114_vm12, %v2056_v59 }
 0x554   : > { %v3740_v33 = vpop.f32.mrb[4].mxu0 }
 0x555   : > { %v2927_v44 = vpop.f32.mrb[5].mxu0 }
 0x556   : > { %v3742_v60 = vpop.f32.mrb[6].mxu0 }
 0x557   : > { %v2928_v4 = vpop.f32.mrb[7].mxu0 }
 0x55e   : > { %v1310_v51 = vpop.f32.mrb[8].mxu0 }
 0x55f   : > { %v2939_v35 = vpop.f32.mrb[9].mxu0 }
 0x560   : > { %v1313_v61 = vpop.f32.mrb[10].mxu0 }
 0x561   : > { %v3089_v37 = vpack.i.bf16 %v1310_v51, %v1313_v61  ;;  %v2940_v1 = vpop.f32.mrb[11].mxu0 }
 0x563   : > { %3090 = vrot.lane.b32.xlu1 %v3089_v37, %s3231_s27 }
 0x593   : > { %v1435_v36 = vpop.f32.mrb[12].mxu0 }
 0x594   : > { %v2951_v47 = vpop.f32.mrb[13].mxu0 }
 0x595   : > { %v1438_v39 = vpop.f32.mrb[14].mxu0 }
 0x596   : > { %v3094_v45 = vpack.i.bf16 %v1435_v36, %v1438_v39  ;;  %v2952_v50 = vpop.f32.mrb[15].mxu0 }
 0x598   : > { %3095 = vrot.lane.b32.xlu0 %v3094_v45, %s3232_s28 }
 0x59b   : > { %v1560_v6 = vpop.f32.mrb[16].mxu0 }
 0x59c   : > { %v2963_v62 = vpop.f32.mrb[17].mxu0 }
 0x59d   : > { %v1563_v27 = vpop.f32.mrb[18].mxu0 }
 0x59e   : > { %v3114_v42 = vpack.i.bf16 %v1560_v6, %v1563_v27  ;;  %v2964_v8 = vpop.f32.mrb[19].mxu0 }
 0x5a3   : > { %v1724_v63 = vpop.f32.mrb[20].mxu0 }
 0x5a4   : > { %v2975_v49 = vpop.f32.mrb[21].mxu0 }
 0x5a5   : > { %v1727_v10 = vpop.f32.mrb[22].mxu0  ;;  %v3203_v49 = vld [vmem:[#allocation2] sm:$0xff] }
 0x5a6   : > { %v2976_v12 = vpop.f32.mrb[23].mxu0 }
 0x5ab   : > { %v1849_v0 = vpop.f32.mrb[24].mxu0 }
 0x5ac   : > { %v2987_v2 = vpop.f32.mrb[25].mxu0 }
 0x5ad   : > { %v1852_v17 = vpop.f32.mrb[26].mxu0 }
 0x5ae   : > { %v3099_v18 = vpack.i.bf16 %v1852_v17, %v1849_v0  ;;  %v2988_v5 = vpop.f32.mrb[27].mxu0  ;;  %v3204_v0 = vld [vmem:[#allocation2 + $0x8] sm:$0xff]  ;;  %v3205_v17 = vld [vmem:[#allocation2 + $0x10] sm:$0x3f] }
 0x5b0   : > { %3100 = vrot.lane.b32.xlu1 %v3099_v18, %s3231_s27  ;;  %s3881_s27 = scalar_lea.vmem %s3845_s11, %s3358_s19 }
 0x5d0   : > { %v1974_v32 = vpop.f32.mrb[28].mxu0 }
 0x5d1   : > { %v2999_v7 = vpop.f32.mrb[29].mxu0 }
 0x5d2   : > { %v1977_v3 = vpop.f32.mrb[30].mxu0 }
 0x5d3   : > { %v3104_v22 = vpack.i.bf16 %v1977_v3, %v1974_v32  ;;  %v3000_v23 = vpop.f32.mrb[31].mxu0 }
 0x5d5   : > { %3105 = vrot.lane.b32.xlu1 %v3104_v22, %s3232_s28  ;;  %v3091_v34 = vpop.permute.xlu1 %3090 }
 0x5d6   : > { %v3093_v41 = vunpack.i.h.bf16 %v3091_v34  ;;  %v3092_v43 = vunpack.i.l.bf16 %v3091_v34 }
 0x5d8   : > { %v2099_v28 = vpop.f32.mrb[32].mxu0  ;;  %v1591_v44 = vsel %vm1064_vm9, %v3740_v33, %v3093_v41  ;;  %v1592_v4 = vsel %vm1064_vm9, %v3742_v60, %v3092_v43  ;;  %v2796_v33 = vld [vmem:[%s3879_s23] ss:$0 sm:$0xff]  ;;  %s3882_s23 = scalar_lea.vmem %s3851_s17, %s3358_s19 }
 0x5d9   : > { %v3011_v13 = vpop.f32.mrb[33].mxu0 }
 0x5da   : > { %v2102_v31 = vpop.f32.mrb[34].mxu0 }
 0x5db   : > { %v3109_v14 = vpack.i.bf16 %v2102_v31, %v2099_v28  ;;  %v3012_v20 = vpop.f32.mrb[35].mxu0 }
 0x5dd   : > { %3110 = vrot.lane.b32.xlu1 %v3109_v14, %s3233_s30 }
 0x5e1   : > { %3115 = vrot.lane.b32.xlu1 %v3114_v42, %s3233_s30 }
 0x60a   : > { %v3096_v21 = vpop.permute.xlu0 %3095 }
 0x60b   : > { %v3098_v15 = vunpack.i.h.bf16 %v3096_v21  ;;  %v3097_v52 = vunpack.i.l.bf16 %v3096_v21 }
 0x60d   : > { %v1594_v61 = vsel %vm1593_vm14, %v1591_v44, %v3098_v15  ;;  %v1595_v37 = vsel %vm1593_vm14, %v1592_v4, %v3097_v52  ;;  %v2801_v52 = vld [vmem:[%s3880_s4] ss:$0 sm:$0xff]  ;;  %s3884_s4 = sld [smem:[#allocation14_spill]] (!%p2815_p5) }
 0x622   : > { %v3101_v38 = vpop.permute.xlu1 %3100 }
 0x623   : > { %v3103_v19 = vunpack.i.h.bf16 %v3101_v38  ;;  %v3102_v24 = vunpack.i.l.bf16 %v3101_v38 }
 0x625   : > { %v2131_v30 = vsel %vm1064_vm9, %v1727_v10, %v3103_v19  ;;  %v2130_v11 = vsel %vm1064_vm9, %v1724_v63, %v3102_v24  ;;  %v3123_v24 = vld [vmem:[%s3390_s6] sm:$0xff]  }
 0x626   : > { %3021 = vmatprep.subr.bf16.mxu0 %v3123_v24 }
 0x627   : > { %3022 = vmatpush3.bf16.msra.mxu0 %v3123_v24 }
 0x647   : > { %v3106_v16 = vpop.permute.xlu1 %3105 }
 0x648   : > { %v3108_v40 = vunpack.i.h.bf16 %v3106_v16  ;;  %v3107_v9 = vunpack.i.l.bf16 %v3106_v16 }
 0x64a   : > { %v2133_v53 = vsel %vm1593_vm14, %v2131_v30, %v3108_v40  ;;  %v2132_v54 = vsel %vm1593_vm14, %v2130_v11, %v3107_v9  ;;  %v3124_v40 = vld [vmem:[%s3390_s6 + $0x8] sm:$0xff]  }
 0x64b   : > { %3023 = vmatprep.subr.bf16.mxu0 %v3124_v40 }
 0x64c   : > { %3024 = vmatpush3.bf16.msra.mxu0 %v3124_v40 }
 0x64f   : > { %v3111_v46 = vpop.permute.xlu1 %3110 }
 0x650   : > { %v3113_v29 = vunpack.i.h.bf16 %v3111_v46  ;;  %v3112_v48 = vunpack.i.l.bf16 %v3111_v46 }
 0x652   : > { %v2135_v55 = vsel %vm1596_vm15, %v2133_v53, %v3113_v29  ;;  %v2134_v56 = vsel %vm1596_vm15, %v2132_v54, %v3112_v48 }
 0x653   : > { %v2140_v57 = vrot.slane %v2135_v55, 5  ;;  %v2139_v58 = vrot.slane %v2134_v56, 5  ;;  %v3116_v59 = vpop.permute.xlu1 %3115 }
 0x654   : > { %v3118_v51 = vunpack.i.h.bf16 %v3116_v59  ;;  %v3117_v35 = vunpack.i.l.bf16 %v3116_v59 }
 0x655   : > { %v2141_v1 = vsel %vm2138_vm0, %v2139_v58, %v2140_v57 }
 0x656   : > { %v1597_v36 = vsel %vm1596_vm15, %v1594_v61, %v3118_v51  ;;  %v1598_v47 = vsel %vm1596_vm15, %v1595_v37, %v3117_v35  ;;  %v2146_v50 = vpack.c.bf16 %v2141_v1, %v2141_v1 }
 0x657   : > { %v2144_v39 = vsel %vm2138_vm0, %v1598_v47, %v2139_v58  ;;  %v2802_v58 = vld [vmem:[%s3881_s27] ss:$0 sm:$0xff]  ;;  %v3126_v47 = vld [vmem:[%s3399_s1 + $0x8] sm:$0xff]  }
 0x658   : > { %v2145_v45 = vpack.c.bf16 %v2144_v39, %v1597_v36  ;;  %v3125_v36 = vld [vmem:[%s3399_s1] sm:$0xff]  }
 0x659   : > { %3029 = vmatprep.subr.bf16.mxu1 %v3125_v36  ;;  %v2803_v39 = vld [vmem:[%s774_s8] ss:$0 sm:$0xff] }
 0x65a   : > { %3017 = vmatprep.mubr.msk.bf16.mxu1 %vm1005_vm7, %v2145_v45 }
 0x65b   : > { %3018 = vmatmul.mubr.msk.bf16.vlgmr.msra.gmra.mrb[32].mxu1 %vm1005_vm7, %v2146_v50 }
 0x65c   : > { %3030 = vmatpush3.bf16.msra.mxu1 %v3125_v36 }
 0x65d   : > { %3031 = vmatprep.subr.bf16.mxu1 %v3126_v47 }
 0x660   : > { %3032 = vmatpush3.bf16.msra.mxu1 %v3126_v47 }
 0x72e   : > { %v3019_v60 = vpop.f32.mrb[32].mxu1 }
 0x72f   : > { %v2210_v6 = vpop.f32.mrb[33].mxu1  ;;  %v2219_v62 = vadd.f32 %v3019_v60, %v2796_v33 }
 0x730   : > { %v2211_v27 = vadd.f32 %v2796_v33, %v2210_v6  ;;  %v3020_v42 = vpop.f32.mrb[34].mxu1 }
 0x731   : > { %v2213_v8 = vpop.f32.mrb[35].mxu1  ;;  %v2226_v18 = vadd.f32 %v3205_v17, %v2219_v62 }
 0x732   : > { %v2214_v63 = vadd.f32 %v2796_v33, %v2213_v8  ;;  %v2224_v10 = vadd.f32 %v3203_v49, %v2211_v27 }
 0x733   : > { %v2236_v32 = vsel %vm2235_vm1, %v2226_v18, 0.0 }
 0x734   : > { %v2229_v12 = vsel %vm1005_vm7, %v2224_v10, 0.0  ;;  %v2225_v2 = vadd.f32 %v3204_v0, %v2214_v63 }
 0x735   : > { %2230 = vadd.xlane.f32.xlu0 %v2229_v12  ;;  %v2808_v12 = vld [vmem:[%s782_s18] ss:$0 sm:$0xff] }
 0x736   : > { %v2232_v5 = vsel %vm1005_vm7, %v2225_v2, 0.0 }
 0x737   : > { %2233 = vadd.xlane.f32.xlu1 %v2232_v5 }
 0x739   : > { %2237 = vadd.xlane.f32.xlu0 %v2236_v32 }
 0x7c2   : > { %v2231_v7 = vpop.xlane.xlu0 %2230 }
 0x7c3   : > { %v2240_v3 = vmul.f32 0.03125, %v2231_v7 }
 0x7c4   : > { %v2234_v22 = vpop.xlane.xlu1 %2233 }
 0x7c5   : > { %v2243_v23 = vsub.f32 %v2224_v10, %v2240_v3  ;;  %v2241_v25 = vmul.f32 0.03125, %v2234_v22 }
 0x7c6   : > { %v2238_v26 = vpop.xlane.xlu0 %2237 }
 0x7c7   : > { %v2244_v28 = vsub.f32 %v2225_v2, %v2241_v25  ;;  %v2242_v13 = vmul.f32 0.03125, %v2238_v26  ;;  %v2246_v31 = vmul.f32 %v2243_v23, %v2243_v23 }
 0x7c9   : > { %v2245_v14 = vsub.f32 %v2226_v18, %v2242_v13  ;;  %v2249_v20 = vsel %vm1005_vm7, %v2246_v31, 0.0  ;;  %v2247_v34 = vmul.f32 %v2244_v28, %v2244_v28 }
 0x7ca   : > { %2250 = vadd.xlane.f32.xlu0 %v2249_v20 }
 0x7cb   : > { %v2252_v38 = vsel %vm1005_vm7, %v2247_v34, 0.0  ;;  %v2248_v16 = vmul.f32 %v2245_v14, %v2245_v14 }
 0x7cc   : > { %2253 = vadd.xlane.f32.xlu1 %v2252_v38 }
 0x7cd   : > { %v2255_v19 = vsel %vm2235_vm1, %v2248_v16, 0.0 }
 0x7ce   : > { %2256 = vadd.xlane.f32.xlu0 %v2255_v19 }
 0x857   : > { %v2251_v9 = vpop.xlane.xlu0 %2250 }
 0x858   : > { %v2258_v21 = vmul.f32 0.03125, %v2251_v9 }
 0x859   : > { %v2254_v41 = vpop.xlane.xlu1 %2253 }
 0x85a   : > { %v2261_v43 = vadd.f32 1e-05, %v2258_v21  ;;  %v2259_v46 = vmul.f32 0.03125, %v2254_v41 }
 0x85b   : > { %v2257_v30 = vpop.xlane.xlu0 %2256 }
 0x85c   : > { %3191 = vrsqrt.f32 %v2261_v43  ;;  %v2262_v11 = vadd.f32 1e-05, %v2259_v46  ;;  %v2260_v29 = vmul.f32 0.03125, %v2257_v30 }
 0x85e   : > { %3193 = vrsqrt.f32 %v2262_v11  ;;  %v2263_v48 = vadd.f32 1e-05, %v2260_v29 }
 0x860   : > { %3195 = vrsqrt.f32 %v2263_v48 }
 0x866   : > { %v3192_v15 = vpop.eup %3191 }
 0x867   : > { %v2267_v53 = vmul.f32 %v3192_v15, %v2243_v23 }
 0x868   : > { %v3194_v54 = vpop.eup %3193 }
 0x869   : > { %v2268_v55 = vmul.f32 %v3194_v54, %v2244_v28  ;;  %v2276_v56 = vmul.f32 %v2801_v52, %v2267_v53 }
 0x86a   : > { %v3196_v57 = vpop.eup %3195 }
 0x86b   : > { %v2269_v59 = vmul.f32 %v3196_v57, %v2245_v14  ;;  %v2277_v44 = vmul.f32 %v2801_v52, %v2268_v55  ;;  %v2285_v4 = vadd.f32 %v2802_v58, %v2276_v56  ;;  %v2813_v57 = vld [vmem:[%s785_s26] ss:$0 sm:$0xff]  ;;  %s3883_s26 = sld [smem:[#allocation13_spill]] (!%p2815_p5) }
 0x86d   : > { %v2286_v51 = vadd.f32 %v2802_v58, %v2277_v44  ;;  %v2278_v35 = vmul.f32 %v2801_v52, %v2269_v59  ;;  %v2814_v44 = vld [vmem:[%s3882_s23] ss:$0 sm:$0xff] }
 0x86f   : > { %v2288_v61 = vpack.c.bf16 %v2286_v51, %v2285_v4  ;;  %v2287_v37 = vadd.f32 %v2802_v58, %v2278_v35 }
 0x871   : > { %3025 = vmatprep.mubr.msk.bf16.mxu0 %vm1005_vm7, %v2288_v61  ;;  %v2289_v1 = vpack.c.bf16 %v2287_v37, %v2287_v37 }
 0x873   : > { %3026 = vmatmul.mubr.msk.bf16.vlgmr.msra.gmra.mrb[36].mxu0 %vm1005_vm7, %v2289_v1 }
 0x946   : > { %v3027_v45 = vpop.f32.mrb[36].mxu0 }
 0x947   : > { %v2362_v50 = vadd.f32 %v3027_v45, %v2803_v39  ;;  %v2353_v33 = vpop.f32.mrb[37].mxu0 }
 0x948   : > { %v2354_v60 = vadd.f32 %v2803_v39, %v2353_v33  ;;  %v3028_v6 = vpop.f32.mrb[38].mxu0  ;;  %v3236_v33 = vmov (!%p2815_p5), 0.0  }
 0x949   : > { %v2356_v62 = vpop.f32.mrb[39].mxu0  ;;  %v2369_v42 = vmax.f32 %v2362_v50, 0.0  ;;  %v3234_v50 = vmov (!%p2815_p5), 0.0|0.0   ;;  %3043 = vmatprep.mubr.msk.f32.mxu0 (!%p2815_p5), %vm3235_vm3, %v3236_v33  ;;  %v3237_v6 = vmov (!%p2815_p5), 0  }
 0x94a   : > { %v2357_v27 = vadd.f32 %v2803_v39, %v2356_v62  ;;  %v2367_v8 = vmax.f32 %v2354_v60, 0.0  ;;  %3046 = vmatprep.subr.bf16.mxu0 (!%p2815_p5), %v3234_v50  ;;  %v2519_v60 = vld [vmem:[#allocation3] sm:$0x1] (!%p2815_p5)  ;;  %3206 = vset.pattern.permute.xlu0 (!%p2815_p5), %v3237_v6  ;;  %v2518_v62 = vld [vmem:[%s3883_s26] sm:$0x1] (!%p2815_p5) }
 0x94b   : > { %v2371_v10 = vpack.c.bf16 %v2369_v42, %v2369_v42 }
 0x94c   : > { %v2368_v63 = vmax.f32 %v2357_v27, 0.0  ;;  %v2525_v27 = vlaneseq (!%p2815_p5) }
 0x94e   : > { %v2370_v49 = vpack.c.bf16 %v2368_v63, %v2367_v8  ;;  %v2526_v42 = vshrl.u32 (!%p2815_p5), %v2525_v27, 7 }
 0x950   : > { %3033 = vmatprep.mubr.msk.bf16.mxu1 %vm1005_vm7, %v2370_v49  ;;  %v2527_v8 = vsub.s32 (!%p2815_p5), 0, %v2526_v42 }
 0x951   : > { %3034 = vmatmul.mubr.msk.bf16.vlgmr.msra.gmra.mrb[36].mxu1 %vm1005_vm7, %v2371_v10 }
 0xa24   : > { %v3035_v0 = vpop.f32.mrb[36].mxu1 }
 0xa25   : > { %v2435_v2 = vpop.f32.mrb[37].mxu1  ;;  %v2444_v17 = vadd.f32 %v3035_v0, %v2808_v12 }
 0xa26   : > { %v2436_v18 = vadd.f32 %v2808_v12, %v2435_v2  ;;  %v3036_v5 = vpop.f32.mrb[38].mxu1 }
 0xa27   : > { %v2438_v32 = vpop.f32.mrb[39].mxu1  ;;  %v2451_v25 = vadd.f32 %v2444_v17, %v2287_v37 }
 0xa28   : > { %v2439_v7 = vadd.f32 %v2808_v12, %v2438_v32  ;;  %v2449_v3 = vadd.f32 %v2436_v18, %v2285_v4 }
 0xa29   : > { %v2460_v28 = vsel %vm2235_vm1, %v2451_v25, 0.0 }
 0xa2a   : > { %v2454_v22 = vsel %vm1005_vm7, %v2449_v3, 0.0  ;;  %v2450_v23 = vadd.f32 %v2439_v7, %v2286_v51 }
 0xa2b   : > { %2455 = vadd.xlane.f32.xlu1 %v2454_v22 }
 0xa2c   : > { %v2457_v26 = vsel %vm1005_vm7, %v2450_v23, 0.0 }
 0xa2d   : > { %2458 = vadd.xlane.f32.xlu0 %v2457_v26 }
 0xa2f   : > { %2461 = vadd.xlane.f32.xlu1 %v2460_v28 }
 0xab8   : > { %v2456_v13 = vpop.xlane.xlu1 %2455 }
 0xab9   : > { %v2463_v31 = vmul.f32 0.03125, %v2456_v13 }
 0xaba   : > { %v2459_v14 = vpop.xlane.xlu0 %2458 }
 0xabb   : > { %v2466_v20 = vsub.f32 %v2449_v3, %v2463_v31  ;;  %v2464_v34 = vmul.f32 0.03125, %v2459_v14 }
 0xabc   : > { %v2462_v38 = vpop.xlane.xlu1 %2461 }
 0xabd   : > { %v2467_v16 = vsub.f32 %v2450_v23, %v2464_v34  ;;  %v2465_v19 = vmul.f32 0.03125, %v2462_v38  ;;  %v2469_v24 = vmul.f32 %v2466_v20, %v2466_v20 }
 0xabf   : > { %v2468_v40 = vsub.f32 %v2451_v25, %v2465_v19  ;;  %v2472_v9 = vsel %vm1005_vm7, %v2469_v24, 0.0  ;;  %v2470_v21 = vmul.f32 %v2467_v16, %v2467_v16 }
 0xac0   : > { %2473 = vadd.xlane.f32.xlu0 %v2472_v9 }
 0xac1   : > { %v2475_v41 = vsel %vm1005_vm7, %v2470_v21, 0.0  ;;  %v2471_v43 = vmul.f32 %v2468_v40, %v2468_v40 }
 0xac2   : > { %2476 = vadd.xlane.f32.xlu1 %v2475_v41 }
 0xac3   : > { %v2478_v46 = vsel %vm2235_vm1, %v2471_v43, 0.0 }
 0xac4   : > { %2479 = vadd.xlane.f32.xlu0 %v2478_v46 }
 0xada   : > { %2522 = vperm.xlu0 (!%p2815_p5), %3206, %v2519_v60  }
 0xb4d   : > { %v2474_v30 = vpop.xlane.xlu0 %2473 }
 0xb4e   : > { %v2481_v11 = vmul.f32 0.03125, %v2474_v30 }
 0xb4f   : > { %v2477_v29 = vpop.xlane.xlu1 %2476 }
 0xb50   : > { %v2484_v48 = vadd.f32 1e-05, %v2481_v11  ;;  %v2482_v15 = vmul.f32 0.03125, %v2477_v29 }
 0xb51   : > { %v2480_v52 = vpop.xlane.xlu0 %2479 }
 0xb52   : > { %3197 = vrsqrt.f32 %v2484_v48  ;;  %v2485_v53 = vadd.f32 1e-05, %v2482_v15  ;;  %v2483_v54 = vmul.f32 0.03125, %v2480_v52 }
 0xb54   : > { %3199 = vrsqrt.f32 %v2485_v53  ;;  %v2486_v55 = vadd.f32 1e-05, %v2483_v54 }
 0xb56   : > { %3201 = vrsqrt.f32 %v2486_v55 }
 0xb59   : > { %v2523_v63 = vpop.permute.xlu0 (!%p2815_p5), %2522 }
 0xb5a   : > { %v2528_v49 = vrot.slane (!%p2815_p5), %v2523_v63, %v2527_v8 }
 0xb5c   : > { %v3198_v56 = vpop.eup %3197 }
 0xb5d   : > { %v2490_v58 = vmul.f32 %v3198_v56, %v2466_v20 }
 0xb5e   : > { %v3200_v59 = vpop.eup %3199 }
 0xb5f   : > { %v2499_v4 = vmul.f32 %v2813_v57, %v2490_v58  ;;  %v2491_v51 = vmul.f32 %v3200_v59, %v2467_v16 }
 0xb60   : > { %v3202_v35 = vpop.eup %3201 }
 0xb61   : > { %v2508_v61 = vadd.f32 %v2814_v44, %v2499_v4  ;;  %v2500_v37 = vmul.f32 %v2813_v57, %v2491_v51  ;;  %v2492_v1 = vmul.f32 %v3202_v35, %v2468_v40  ;;  %2517 = sbr.rel (%p2815_p5) target bundleno = 3146 (0xc4a), region = 108 }
 0xb63   : > { %2511 = vst.msk [vmem:[#allocation2] sm:$0xff] %vm1005_vm7, %v2508_v61  ;;  %v2509_v36 = vadd.f32 %v2814_v44, %v2500_v37  ;;  %v2501_v47 = vmul.f32 %v2813_v57, %v2492_v1 }
 0xb65   : > { %2512 = vst.msk [vmem:[#allocation2 + $0x8] sm:$0xff] %vm1005_vm7, %v2509_v36  ;;  %v2510_v39 = vadd.f32 %v2814_v44, %v2501_v47  ;;  %v3047_v45 = vpack.c.bf16 (!%p2815_p5), %v2509_v36, %v2508_v61 }
 0xb67   : > { %2513 = vst.msk [vmem:[#allocation2 + $0x10] sm:$0x3f] %vm2235_vm1, %v2510_v39  ;;  %3049 = vmatpush3.bf16.xpose.msk.msra.mxu0 (!%p2815_p5), %vm3048_vm2, %v3047_v45 }
 0xb68   : > { %3041 = vmatprep.subr.mxu0 %v3236_v33 }
 0xb6f   : > { %3042 = vmatpush3.xpose.msk.msra.mxu0 %vm1005_vm7, %v2510_v39 }
 0xb72   : > { %3044 = vmatmul.mubr.msk.f32.vlgmr.msra.gmra.mrb[0].mxu0 %vm1005_vm7, %v2518_v62 }
 0xc45   : > { %v2607_v10 = vpop.f32.mrb[0].mxu0 }
 0xc46   : > { %v2608_v12 = vadd.f32 %v2607_v10, %v2528_v49  ;;  %v3045_v0 = vpop.f32.mrb[1].mxu0 }
 0xc48   : > { %v2612_v2 = vsel %vm2611_vm4, %v2608_v12, 0.0 }
 0xc49   : > { %2613 = vst [vmem:[%s3884_s4] sm:$0x1] %v2612_v2 }
 0xc4a PF: > { %s3885_s22 = sld [smem:[#allocation4_spill]] }
 0xc50   : > { %s32_s23 = sadd.s32 1, %s3885_s22  }
 0xc51   : > { %p29_p6 = scmp.ge.s32.totalorder %s32_s23, 4  }
 0xc53   :  { %31 = sbr.rel (!%p29_p6) target bundleno = 10 (0xa), region = 167 }

</bundles_post_ra>
